<compile_context>
chip_gen: v7x
topology: tpu7x:2x2x1
jax: 0.10.0
libtpu: 0.0.40
codegen_flags: <defaults>
</compile_context>

<pallas_src>
import jax
import jax.numpy as jnp
from jax.experimental import pallas as pl
from jax.experimental.pallas import tpu as pltpu

K_IN = 28 * 28      # 784
HIDDEN = 512
OUT = 10
OUT_PAD = 128       # lane-dense output slab


def _round_up(n, m):
    return (n + m - 1) // m * m


def _mlp_kernel(x_ref, w1_ref, b1_ref, w2_ref, b2_ref, w3_ref, b3_ref, out_ref):
    # One batch tile (TB rows) per grid step.  x arrives as bf16; weights are
    # bf16 with a constant block index, so they are fetched once and stay
    # VMEM-resident across all grid steps; x/out tiles are double-buffered by
    # Pallas.  All matmuls accumulate in f32 on the MXU.

    # fc1 + ReLU
    h1 = jnp.dot(x_ref[...], w1_ref[...], preferred_element_type=jnp.float32)
    h1 = jnp.maximum(h1 + b1_ref[...], 0.0)                    # (TB, 512) f32

    # fc2 + ReLU (bf16 cast kept adjacent to the dot so it hides under MXU pushes)
    h2 = jnp.dot(h1.astype(jnp.bfloat16), w2_ref[...],
                 preferred_element_type=jnp.float32)
    h2 = jnp.maximum(h2 + b2_ref[...], 0.0)                    # (TB, 512) f32

    # fc3 (logits; output lanes padded to 128 for an unmasked store)
    logits = jnp.dot(h2.astype(jnp.bfloat16), w3_ref[...],
                     preferred_element_type=jnp.float32)
    out_ref[...] = (logits + b3_ref[...]).astype(out_ref.dtype)  # (TB, 128)


def init_params(key):
    """nn.Linear-style init: U(-1/sqrt(fan_in), +1/sqrt(fan_in)).

    Weights stored as (in_features, out_features) = PyTorch weight transposed,
    biases as (1, out_features), all float32 (the 'master' params).
    """
    dims = [(K_IN, HIDDEN), (HIDDEN, HIDDEN), (HIDDEN, OUT)]
    params = {}
    for idx, (fan_in, fan_out) in enumerate(dims, start=1):
        key, kw, kb = jax.random.split(key, 3)
        bound = 1.0 / (fan_in ** 0.5)
        params[f"w{idx}"] = jax.random.uniform(
            kw, (fan_in, fan_out), jnp.float32, minval=-bound, maxval=bound)
        params[f"b{idx}"] = jax.random.uniform(
            kb, (1, fan_out), jnp.float32, minval=-bound, maxval=bound)
    return params


def prepare_params(params):
    """Cast weights to bf16 and zero-pad to TPU-friendly shapes (done once)."""
    w1 = params["w1"].astype(jnp.bfloat16)                      # (784, 512)
    w2 = params["w2"].astype(jnp.bfloat16)                      # (512, 512)
    w3 = jnp.zeros((HIDDEN, OUT_PAD), jnp.bfloat16).at[:, :OUT].set(
        params["w3"].astype(jnp.bfloat16))                      # (512, 128)
    b1 = params["b1"].astype(jnp.float32)                       # (1, 512)
    b2 = params["b2"].astype(jnp.float32)                       # (1, 512)
    b3 = jnp.zeros((1, OUT_PAD), jnp.float32).at[:, :OUT].set(
        params["b3"].astype(jnp.float32))                       # (1, 128)
    return dict(w1=w1, b1=b1, w2=w2, b2=b2, w3=w3, b3=b3)


def mnist_net_forward(x, prepped, *, batch_tile=512):
    """x: (B, 1, 28, 28) or (B, 784). prepped: output of prepare_params."""
    x2d = x.reshape(-1, K_IN)                        # == torch x.view(-1, 784)
    B = x2d.shape[0]

    # Batch tile: multiple of 16 sublanes (bf16 packing); capped so that for
    # medium/large batches grid_b >= 2 (keeps both v7x TensorCores busy).
    TB = min(batch_tile, max(16, _round_up(pl.cdiv(B, 2), 16)))
    grid_b = pl.cdiv(B, TB)
    B_pad = grid_b * TB

    # Zero-pad batch to a whole number of tiles; deliver x as bf16 (halves the
    # dominant per-step DMA and removes the in-kernel cast).
    xp = jnp.zeros((B_pad, K_IN), jnp.bfloat16).at[:B, :].set(
        x2d.astype(jnp.bfloat16))

    w1, b1 = prepped["w1"], prepped["b1"]
    w2, b2 = prepped["w2"], prepped["b2"]
    w3, b3 = prepped["w3"], prepped["b3"]

    # Weights/biases: full-array block, constant block index -> VMEM-resident.
    resident = lambda arr: pl.BlockSpec(arr.shape, lambda i: (0, 0))

    out_padded = pl.pallas_call(
        _mlp_kernel,
        out_shape=jax.ShapeDtypeStruct((B_pad, OUT_PAD), jnp.float32),
        grid=(grid_b,),
        in_specs=[
            pl.BlockSpec((TB, K_IN), lambda i: (i, 0)),   # x: tiled over batch
            resident(w1), resident(b1),
            resident(w2), resident(b2),
            resident(w3), resident(b3),
        ],
        out_specs=pl.BlockSpec((TB, OUT_PAD), lambda i: (i, 0)),
        compiler_params=pltpu.CompilerParams(
            dimension_semantics=("parallel",),   # batch tiles across TCs (v7x)
            vmem_limit_bytes=16 << 20,
        ),
    )(xp, w1, b1, w2, b2, w3, b3)

    return out_padded[:B, :OUT]


def _reference(x, params):
    """Plain-JAX reference applying the same bf16 weight/activation casts."""
    xr = x.reshape(-1, K_IN)
    w1 = params["w1"].astype(jnp.bfloat16)
    w2 = params["w2"].astype(jnp.bfloat16)
    w3 = params["w3"].astype(jnp.bfloat16)
    h = jnp.dot(xr.astype(jnp.bfloat16), w1,
                preferred_element_type=jnp.float32) + params["b1"]
    h = jnp.maximum(h, 0.0)
    h = jnp.dot(h.astype(jnp.bfloat16), w2,
                preferred_element_type=jnp.float32) + params["b2"]
    h = jnp.maximum(h, 0.0)
    return jnp.dot(h.astype(jnp.bfloat16), w3,
                   preferred_element_type=jnp.float32) + params["b3"]


if __name__ == "__main__":
    key = jax.random.PRNGKey(0)
    key, kx = jax.random.split(key)

    params = init_params(key)
    prepped = prepare_params(params)

    # Small MNIST-like batch: (B=8, C=1, H=28, W=28), NCHW like PyTorch.
    x = jax.random.normal(kx, (8, 1, 28, 28), dtype=jnp.float32)

    out = mnist_net_forward(x, prepped)
    out = jax.block_until_ready(out)
    assert out.shape == (8, 10), out.shape

    ref = _reference(x, params)
    assert jnp.allclose(out, ref, atol=1e-2, rtol=1e-2), (
        float(jnp.max(jnp.abs(out - ref))))

    print("KERNEL_OK")
</pallas_src>

<mosaic_0001>
module attributes {stable_mosaic.version = 11 : i64} {
  func.func @_mlp_kernel(%arg0: i32, %arg1: memref<16x784xbf16, #tpu.memory_space<vmem>>, %arg2: memref<784x512xbf16, #tpu.memory_space<vmem>>, %arg3: memref<1x512xf32, #tpu.memory_space<vmem>>, %arg4: memref<512x512xbf16, #tpu.memory_space<vmem>>, %arg5: memref<1x512xf32, #tpu.memory_space<vmem>>, %arg6: memref<512x128xbf16, #tpu.memory_space<vmem>>, %arg7: memref<1x128xf32, #tpu.memory_space<vmem>>, %arg8: memref<16x128xf32, #tpu.memory_space<vmem>>) attributes {dimension_semantics = [#tpu.dimension_semantics<parallel>], iteration_bounds = array<i64: 1>, scalar_prefetch = 0 : i64, scratch_operands = 0 : i64, tpu.core_type = #tpu.core_type<tc>, window_params = [{transform_indices = @transform_0, window_bounds = array<i64: 16, 784>}, {pipeline_mode = #tpu.pipeline_mode<synchronous>, transform_indices = @transform_1, window_bounds = array<i64: 784, 512>}, {pipeline_mode = #tpu.pipeline_mode<synchronous>, transform_indices = @transform_2, window_bounds = array<i64: 1, 512>}, {pipeline_mode = #tpu.pipeline_mode<synchronous>, transform_indices = @transform_3, window_bounds = array<i64: 512, 512>}, {pipeline_mode = #tpu.pipeline_mode<synchronous>, transform_indices = @transform_4, window_bounds = array<i64: 1, 512>}, {pipeline_mode = #tpu.pipeline_mode<synchronous>, transform_indices = @transform_5, window_bounds = array<i64: 512, 128>}, {pipeline_mode = #tpu.pipeline_mode<synchronous>, transform_indices = @transform_6, window_bounds = array<i64: 1, 128>}, {transform_indices = @transform_7, window_bounds = array<i64: 16, 128>}]} {
    %c0 = arith.constant 0 : index
    %c0_0 = arith.constant 0 : index
    %0 = vector.load %arg1[%c0, %c0_0] : memref<16x784xbf16, #tpu.memory_space<vmem>>, vector<16x784xbf16>
    %c0_1 = arith.constant 0 : index
    %c0_2 = arith.constant 0 : index
    %1 = vector.load %arg2[%c0_1, %c0_2] : memref<784x512xbf16, #tpu.memory_space<vmem>>, vector<784x512xbf16>
    %cst = arith.constant dense<0.000000e+00> : vector<16x512xf32>
    %2 = tpu.matmul %0, %1, %cst {dimension_numbers = #tpu.dot_dimension_numbers<[1], [0], [0], [1], [0, 0, 1, 1], [], []>} : vector<16x784xbf16>, vector<784x512xbf16>, vector<16x512xf32> -> vector<16x512xf32>
    %c0_3 = arith.constant 0 : index
    %c0_4 = arith.constant 0 : index
    %3 = vector.load %arg3[%c0_3, %c0_4] : memref<1x512xf32, #tpu.memory_space<vmem>>, vector<1x512xf32>
    %4 = vector.broadcast %3 : vector<1x512xf32> to vector<16x512xf32>
    %5 = arith.addf %2, %4 : vector<16x512xf32>
    %cst_5 = arith.constant 0.000000e+00 : f32
    %6 = vector.broadcast %cst_5 : f32 to vector<16x512xf32>
    %7 = arith.maximumf %5, %6 : vector<16x512xf32>
    %8 = arith.truncf %7 : vector<16x512xf32> to vector<16x512xbf16>
    %c0_6 = arith.constant 0 : index
    %c0_7 = arith.constant 0 : index
    %9 = vector.load %arg4[%c0_6, %c0_7] : memref<512x512xbf16, #tpu.memory_space<vmem>>, vector<512x512xbf16>
    %cst_8 = arith.constant dense<0.000000e+00> : vector<16x512xf32>
    %10 = tpu.matmul %8, %9, %cst_8 {dimension_numbers = #tpu.dot_dimension_numbers<[1], [0], [0], [1], [0, 0, 1, 1], [], []>} : vector<16x512xbf16>, vector<512x512xbf16>, vector<16x512xf32> -> vector<16x512xf32>
    %c0_9 = arith.constant 0 : index
    %c0_10 = arith.constant 0 : index
    %11 = vector.load %arg5[%c0_9, %c0_10] : memref<1x512xf32, #tpu.memory_space<vmem>>, vector<1x512xf32>
    %12 = vector.broadcast %11 : vector<1x512xf32> to vector<16x512xf32>
    %13 = arith.addf %10, %12 : vector<16x512xf32>
    %cst_11 = arith.constant 0.000000e+00 : f32
    %14 = vector.broadcast %cst_11 : f32 to vector<16x512xf32>
    %15 = arith.maximumf %13, %14 : vector<16x512xf32>
    %16 = arith.truncf %15 : vector<16x512xf32> to vector<16x512xbf16>
    %c0_12 = arith.constant 0 : index
    %c0_13 = arith.constant 0 : index
    %17 = vector.load %arg6[%c0_12, %c0_13] : memref<512x128xbf16, #tpu.memory_space<vmem>>, vector<512x128xbf16>
    %cst_14 = arith.constant dense<0.000000e+00> : vector<16x128xf32>
    %18 = tpu.matmul %16, %17, %cst_14 {dimension_numbers = #tpu.dot_dimension_numbers<[1], [0], [0], [1], [0, 0, 1, 1], [], []>} : vector<16x512xbf16>, vector<512x128xbf16>, vector<16x128xf32> -> vector<16x128xf32>
    %c0_15 = arith.constant 0 : index
    %c0_16 = arith.constant 0 : index
    %19 = vector.load %arg7[%c0_15, %c0_16] : memref<1x128xf32, #tpu.memory_space<vmem>>, vector<1x128xf32>
    %20 = vector.broadcast %19 : vector<1x128xf32> to vector<16x128xf32>
    %21 = arith.addf %18, %20 : vector<16x128xf32>
    %c0_17 = arith.constant 0 : index
    %c0_18 = arith.constant 0 : index
    %22 = vector.load %arg8[%c0_17, %c0_18] : memref<16x128xf32, #tpu.memory_space<vmem>>, vector<16x128xf32>
    tpu.vector_store %arg8[%c0_17, %c0_18], %21 {strides = array<i32>} : memref<16x128xf32, #tpu.memory_space<vmem>>, vector<16x128xf32>,
    return
  }
  func.func @transform_0(%arg0: i32) -> (i32, i32) {
    %c0_i32 = arith.constant 0 : i32
    %c0_i32_0 = arith.constant 0 : i32
    return %arg0, %c0_i32 : i32, i32
  }
  func.func @transform_1(%arg0: i32) -> (i32, i32) {
    %c0_i32 = arith.constant 0 : i32
    %c0_i32_0 = arith.constant 0 : i32
    %c0_i32_1 = arith.constant 0 : i32
    return %c0_i32, %c0_i32_0 : i32, i32
  }
  func.func @transform_2(%arg0: i32) -> (i32, i32) {
    %c0_i32 = arith.constant 0 : i32
    %c0_i32_0 = arith.constant 0 : i32
    %c0_i32_1 = arith.constant 0 : i32
    return %c0_i32, %c0_i32_0 : i32, i32
  }
  func.func @transform_3(%arg0: i32) -> (i32, i32) {
    %c0_i32 = arith.constant 0 : i32
    %c0_i32_0 = arith.constant 0 : i32
    %c0_i32_1 = arith.constant 0 : i32
    return %c0_i32, %c0_i32_0 : i32, i32
  }
  func.func @transform_4(%arg0: i32) -> (i32, i32) {
    %c0_i32 = arith.constant 0 : i32
    %c0_i32_0 = arith.constant 0 : i32
    %c0_i32_1 = arith.constant 0 : i32
    return %c0_i32, %c0_i32_0 : i32, i32
  }
  func.func @transform_5(%arg0: i32) -> (i32, i32) {
    %c0_i32 = arith.constant 0 : i32
    %c0_i32_0 = arith.constant 0 : i32
    %c0_i32_1 = arith.constant 0 : i32
    return %c0_i32, %c0_i32_0 : i32, i32
  }
  func.func @transform_6(%arg0: i32) -> (i32, i32) {
    %c0_i32 = arith.constant 0 : i32
    %c0_i32_0 = arith.constant 0 : i32
    %c0_i32_1 = arith.constant 0 : i32
    return %c0_i32, %c0_i32_0 : i32, i32
  }
  func.func @transform_7(%arg0: i32) -> (i32, i32) {
    %c0_i32 = arith.constant 0 : i32
    %c0_i32_0 = arith.constant 0 : i32
    return %arg0, %c0_i32 : i32, i32
  }
}

</mosaic_0001>

<bundles_post_ra>
// kernel: tpu_custom_call.1
= control target key start
LH: loop header
LB: loop body
LE: loop exit
PB: predicated region body
PF: predicated region fallthrough
CT: control target
= control target key end

     0   :  { %12 = vsyncpa [#allocation3], 0  ;;  %s4304_s0 = inlined_call_operand.hbm [shape: bf16[16,784], index: 0, kind: input, shape index: {}]   ;;  %s4305_s1 = inlined_call_operand.hbm [shape: bf16[784,512], index: 1, kind: input, shape index: {}]   ;;  %s4306_s2 = inlined_call_operand.vmem [shape: f32[1,512], index: 2, kind: input, shape index: {}]   ;;  %s4307_s3 = inlined_call_operand.hbm [shape: bf16[512,512], index: 3, kind: input, shape index: {}]   ;;  %s4308_s4 = inlined_call_operand.vmem [shape: f32[1,512], index: 4, kind: input, shape index: {}]   ;;  %s4309_s5 = inlined_call_operand.hbm [shape: bf16[512,128], index: 5, kind: input, shape index: {}]   ;;  %s4310_s6 = inlined_call_operand.vmem [shape: f32[1,128], index: 6, kind: input, shape index: {}]   ;;  %s4311_s7 = inlined_call_operand.hbm [shape: f32[16,128], index: 7, kind: output, shape index: {}]  }
   0x1   :  { %13 = vsyncpa [#allocation6], 0 }
   0x2   :  { %14 = vsyncpa [#allocation9], 0 }
   0x3   :  { %15 = vsyncpa [#allocation4], 0  ;;  %s4142_s24 = smov [#allocation5]   ;;  %s4024_s28 = scalar_lea.hbm %s4305_s1, 25088 }
   0x4   :  { %s33_s25 = sshll.u32 %s4142_s24, 4  ;;  %p4025_p0 = scmp.ne.s32.totalorder %s4305_s1, %s4024_s28  ;;  %s34_s25 = int_to_ptr.vmem [resolvable:$true] %s33_s25 }
   0x5   :  { %p4028_p1 = scmp.lt.u32.totalorder %s4024_s28, %s4305_s1 }
   0x7   :  { %p4030_p2 = pnand %p4028_p1, %p4025_p0 }
   0x9   :  { %4033 = shalt.err (!%p4030_p2)
}
   0xa   :  { %s4034_s10 = scalar_lea.vmem %s34_s25, 25088  ;;  %p4039_p4 = scmp.lt.s32.totalorder %s34_s25, %s34_s25 }
   0xb   :  { %p4035_p3 = scmp.ne.s32.totalorder %s34_s25, %s4034_s10  ;;  %p4040_p5 = scmp.lt.s32.totalorder %s4034_s10, %s4034_s10 }
   0xd   :  { %p4041_p6 = por %p4040_p5, %p4039_p4 }
   0xf   :  { %p4042_p7 = pnand %p4041_p6, %p4035_p3 }
  0x11   :  { %4045 = shalt.err (!%p4042_p7)
}
  0x12   :  { %s4143_s11 = smov 256   ;;  %s4144_s12 = smov 16  }
  0x13   :  { %39 = dma.hbm_to_vmem [thread:$0]  %s4305_s1, 25088, %s34_s25, [#allocation6], %s4143_s11, %s4143_s11, %s4144_s12  }
  0x14   :  { %s4145_s15 = smov [#allocation2]   ;;  %s4046_s19 = scalar_lea.hbm %s4304_s0, 896 }
  0x15   :  { %s21_s16 = sshll.u32 %s4145_s15, 4  ;;  %p4047_p8 = scmp.ne.s32.totalorder %s4304_s0, %s4046_s19  ;;  %s22_s16 = int_to_ptr.vmem [resolvable:$true] %s21_s16 }
  0x16   :  { %p4050_p9 = scmp.lt.u32.totalorder %s4046_s19, %s4304_s0 }
  0x18   :  { %p4052_p10 = pnand %p4050_p9, %p4047_p8 }
  0x1a   :  { %4055 = shalt.err (!%p4052_p10)
}
  0x1b   :  { %s4056_s24 = scalar_lea.vmem %s22_s16, 896  ;;  %p4061_p12 = scmp.lt.s32.totalorder %s22_s16, %s22_s16 }
  0x1c   :  { %p4057_p11 = scmp.ne.s32.totalorder %s22_s16, %s4056_s24  ;;  %p4062_p13 = scmp.lt.s32.totalorder %s4056_s24, %s4056_s24 }
  0x1e   :  { %p4063_p0 = por %p4062_p13, %p4061_p12 }
  0x20   :  { %p4064_p1 = pnand %p4063_p0, %p4057_p11 }
  0x22   :  { %4067 = shalt.err (!%p4064_p1)
}
  0x23   :  { %s4146_s1 = smov 448   ;;  %s4147_s25 = smov 28  }
  0x24   :  { %27 = dma.hbm_to_vmem [thread:$0]  %s4304_s0, 896, %s22_s16, [#allocation3], %s4146_s1, %s4146_s1, %s4147_s25  }
  0x25   :  { %s4148_s28 = smov [#allocation7]   ;;  %s4149_s30 = smov [#allocation8]  }
  0x26   :  { %s47_s29 = sshll.u32 %s4148_s28, 4  ;;  %s61_s8 = sshll.u32 %s4149_s30, 4  ;;  %s48_s29 = int_to_ptr.vmem [resolvable:$true] %s47_s29  ;;  %s4223_s8 = int_to_ptr.vmem [resolvable:$true] %s61_s8 }
  0x27   :  { %s4068_s13 = scalar_lea.hbm %s4307_s3, 16384 }
  0x28   :  { %p4069_p2 = scmp.ne.s32.totalorder %s4307_s3, %s4068_s13  ;;  %p4072_p3 = scmp.lt.u32.totalorder %s4068_s13, %s4307_s3 }
  0x2a   :  { %p4074_p4 = pnand %p4072_p3, %p4069_p2 }
  0x2c   :  { %4077 = shalt.err (!%p4074_p4)
}
  0x2d   :  { %s4078_s0 = scalar_lea.vmem %s48_s29, 16384  ;;  %p4083_p6 = scmp.lt.s32.totalorder %s48_s29, %s48_s29 }
  0x2e   :  { %p4079_p5 = scmp.ne.s32.totalorder %s48_s29, %s4078_s0  ;;  %p4084_p7 = scmp.lt.s32.totalorder %s4078_s0, %s4078_s0 }
  0x30   :  { %p4085_p8 = por %p4084_p7, %p4083_p6 }
  0x32   :  { %p4086_p9 = pnand %p4085_p8, %p4079_p5 }
  0x34   :  { %4089 = shalt.err (!%p4086_p9)
}
  0x35   :  { %53 = dma.hbm_to_vmem [thread:$0]  %s4307_s3, 16384, %s48_s29, [#allocation6], %s4143_s11, %s4143_s11, %s4144_s12  }
  0x36   :  { %s4090_s22 = scalar_lea.hbm %s4309_s5, 4096 }
  0x37   :  { %p4091_p10 = scmp.ne.s32.totalorder %s4309_s5, %s4090_s22  ;;  %p4094_p11 = scmp.lt.u32.totalorder %s4090_s22, %s4309_s5 }
  0x39   :  { %p4096_p12 = pnand %p4094_p11, %p4091_p10 }
  0x3b   :  { %4099 = shalt.err (!%p4096_p12)
}
  0x3c   :  { %s4100_s26 = scalar_lea.vmem %s4223_s8, 4096  ;;  %p4105_p0 = scmp.lt.s32.totalorder %s4223_s8, %s4223_s8 }
  0x3d   :  { %p4101_p13 = scmp.ne.s32.totalorder %s4223_s8, %s4100_s26  ;;  %p4106_p1 = scmp.lt.s32.totalorder %s4100_s26, %s4100_s26 }
  0x3f   :  { %p4107_p2 = por %p4106_p1, %p4105_p0 }
  0x41   :  { %p4108_p3 = pnand %p4107_p2, %p4101_p13 }
  0x43   :  { %4111 = shalt.err (!%p4108_p3)
}
  0x44   :  { %s4150_s3 = smov 64   ;;  %s4151_s11 = smov 4  }
  0x45   :  { %67 = dma.hbm_to_vmem [thread:$0]  %s4309_s5, 4096, %s4223_s8, [#allocation9], %s4150_s3, %s4150_s3, %s4151_s11  }
  0x46   :  { %4134 = dma.done.wait [#allocation3], 896  }
  0x47   :  { %4135 = vsyncadd [#allocation3], 4294966400 }
  0x48   :  { %4136 = dma.done.wait [#allocation6], 41472  }
  0x49   :  { %4137 = vsyncadd [#allocation6], 4294925824 }
  0x4a   :  { %4138 = dma.done.wait [#allocation9], 4096  }
  0x4b   :  { %4139 = vsyncadd [#allocation9], 4294963200  ;;  %v3496_v0 = vld [vmem:[#allocation5 + $0x4] ss:$16 sps:$4 sm:$0xff]   ;;  %v3498_v1 = vld [vmem:[#allocation5 + $0xc] ss:$16 sps:$4 sm:$0xff]  }
  0x4c   :  { %1328 = vmatprep.subr.bf16.mxu0 %v3496_v0  ;;  %v3500_v2 = vld [vmem:[#allocation5] ss:$16 sps:$4 sm:$0xff]   ;;  %v3501_v3 = vld [vmem:[#allocation5 + $0x8] ss:$16 sps:$4 sm:$0xff]   ;;  %1500 = vmatprep.subr.bf16.mxu1 %v3498_v1  ;;  %v3502_v4 = vld [vmem:[#allocation5 + $0x24] ss:$16 sps:$4 sm:$0xff]  }
  0x4d   :  { %1329 = vmatpush1.bf16.msra.mxu0 %v3500_v2  ;;  %1501 = vmatpush1.bf16.msra.mxu1 %v3501_v3  ;;  %v3504_v5 = vld [vmem:[#allocation5 + $0x2c] ss:$16 sps:$4 sm:$0xff]   ;;  %v3506_v6 = vld [vmem:[#allocation5 + $0x20] ss:$16 sps:$4 sm:$0xff]   ;;  %v3507_v7 = vld [vmem:[#allocation5 + $0x28] ss:$16 sps:$4 sm:$0xff]  }
  0x4e   :  { %1330 = vmatprep.subr.bf16.mxu0 %v3502_v4  ;;  %1502 = vmatprep.subr.bf16.mxu1 %v3504_v5  ;;  %v3508_v8 = vld [vmem:[#allocation5 + $0x44] ss:$16 sps:$4 sm:$0xff]   ;;  %v3510_v9 = vld [vmem:[#allocation5 + $0x4c] ss:$16 sps:$4 sm:$0xff]   ;;  %v3512_v10 = vld [vmem:[#allocation5 + $0x40] ss:$16 sps:$4 sm:$0xff]  }
  0x4f   :  { %v3513_v11 = vld [vmem:[#allocation5 + $0x48] ss:$16 sps:$4 sm:$0xff]   ;;  %v3514_v12 = vld [vmem:[#allocation5 + $0x64] ss:$16 sps:$4 sm:$0xff]   ;;  %v3516_v13 = vld [vmem:[#allocation5 + $0x6c] ss:$16 sps:$4 sm:$0xff]  }
  0x50   :  { %v3518_v14 = vld [vmem:[#allocation5 + $0x60] ss:$16 sps:$4 sm:$0xff]   ;;  %v3519_v15 = vld [vmem:[#allocation5 + $0x68] ss:$16 sps:$4 sm:$0xff]   ;;  %v3520_v16 = vld [vmem:[#allocation5 + $0x84] ss:$16 sps:$4 sm:$0xff]  }
  0x51   :  { %1331 = vmatpush1.bf16.msra.mxu0 %v3506_v6  ;;  %1503 = vmatpush1.bf16.msra.mxu1 %v3507_v7  ;;  %v3522_v17 = vld [vmem:[#allocation5 + $0x8c] ss:$16 sps:$4 sm:$0xff]   ;;  %v3524_v18 = vld [vmem:[#allocation5 + $0x80] ss:$16 sps:$4 sm:$0xff]   ;;  %v3525_v19 = vld [vmem:[#allocation5 + $0x88] ss:$16 sps:$4 sm:$0xff]  }
  0x52   :  { %1332 = vmatprep.subr.bf16.mxu0 %v3508_v8  ;;  %1504 = vmatprep.subr.bf16.mxu1 %v3510_v9  ;;  %v3526_v20 = vld [vmem:[#allocation5 + $0xa4] ss:$16 sps:$4 sm:$0xff]   ;;  %v3528_v21 = vld [vmem:[#allocation5 + $0xac] ss:$16 sps:$4 sm:$0xff]   ;;  %v3530_v22 = vld [vmem:[#allocation5 + $0xa0] ss:$16 sps:$4 sm:$0xff]  }
  0x53   :  { %v3531_v23 = vld [vmem:[#allocation5 + $0xa8] ss:$16 sps:$4 sm:$0xff]   ;;  %v3532_v24 = vld [vmem:[#allocation5 + $0xc4] ss:$16 sps:$4 sm:$0xff]   ;;  %v3534_v25 = vld [vmem:[#allocation5 + $0xcc] ss:$16 sps:$4 sm:$0xff]  }
  0x54   :  { %v3536_v26 = vld [vmem:[#allocation5 + $0xc0] ss:$16 sps:$4 sm:$0xff]   ;;  %v3537_v27 = vld [vmem:[#allocation5 + $0xc8] ss:$16 sps:$4 sm:$0xff]   ;;  %v3538_v28 = vld [vmem:[#allocation5 + $0xe4] ss:$16 sps:$4 sm:$0xff]  }
  0x55   :  { %1333 = vmatpush1.bf16.msra.mxu0 %v3512_v10  ;;  %1505 = vmatpush1.bf16.msra.mxu1 %v3513_v11  ;;  %v3540_v29 = vld [vmem:[#allocation5 + $0xec] ss:$16 sps:$4 sm:$0xff]   ;;  %v3542_v30 = vld [vmem:[#allocation5 + $0xe0] ss:$16 sps:$4 sm:$0xff]   ;;  %v3543_v31 = vld [vmem:[#allocation5 + $0xe8] ss:$16 sps:$4 sm:$0xff]  }
  0x56   :  { %1334 = vmatprep.subr.bf16.mxu0 %v3514_v12  ;;  %1506 = vmatprep.subr.bf16.mxu1 %v3516_v13  ;;  %v3544_v32 = vld [vmem:[#allocation5 + $0x104] ss:$16 sps:$4 sm:$0xff]   ;;  %v3546_v33 = vld [vmem:[#allocation5 + $0x10c] ss:$16 sps:$4 sm:$0xff]   ;;  %v3548_v34 = vld [vmem:[#allocation5 + $0x100] ss:$16 sps:$4 sm:$0xff]  }
  0x57   :  { %v3549_v35 = vld [vmem:[#allocation5 + $0x108] ss:$16 sps:$4 sm:$0xff]   ;;  %v3550_v36 = vld [vmem:[#allocation5 + $0x124] ss:$16 sps:$4 sm:$0xff]   ;;  %v3552_v37 = vld [vmem:[#allocation5 + $0x12c] ss:$16 sps:$4 sm:$0xff]  }
  0x58   :  { %v3554_v38 = vld [vmem:[#allocation5 + $0x120] ss:$16 sps:$4 sm:$0xff]   ;;  %v3555_v39 = vld [vmem:[#allocation5 + $0x128] ss:$16 sps:$4 sm:$0xff]   ;;  %v3556_v40 = vld [vmem:[#allocation5 + $0x144] ss:$16 sps:$4 sm:$0xff]  }
  0x59   :  { %1335 = vmatpush1.bf16.msra.mxu0 %v3518_v14  ;;  %1507 = vmatpush1.bf16.msra.mxu1 %v3519_v15  ;;  %v3558_v41 = vld [vmem:[#allocation5 + $0x14c] ss:$16 sps:$4 sm:$0xff]   ;;  %v3560_v42 = vld [vmem:[#allocation5 + $0x140] ss:$16 sps:$4 sm:$0xff]   ;;  %v3561_v43 = vld [vmem:[#allocation5 + $0x148] ss:$16 sps:$4 sm:$0xff]  }
  0x5a   :  { %1336 = vmatprep.subr.bf16.mxu0 %v3520_v16  ;;  %1508 = vmatprep.subr.bf16.mxu1 %v3522_v17  ;;  %v3562_v44 = vld [vmem:[#allocation5 + $0x164] ss:$16 sps:$4 sm:$0xff]   ;;  %v3564_v45 = vld [vmem:[#allocation5 + $0x16c] ss:$16 sps:$4 sm:$0xff]   ;;  %v3566_v46 = vld [vmem:[#allocation5 + $0x160] ss:$16 sps:$4 sm:$0xff]  }
  0x5b   :  { %v3567_v47 = vld [vmem:[#allocation5 + $0x168] ss:$16 sps:$4 sm:$0xff]   ;;  %v3568_v49 = vld [vmem:[#allocation5 + $0x184] ss:$16 sps:$4 sm:$0xff]   ;;  %v3570_v50 = vld [vmem:[#allocation5 + $0x18c] ss:$16 sps:$4 sm:$0xff]  }
  0x5c   :  { %v3594_v48 = vld [vmem:[#allocation2 + $0x4] ss:$28 sps:$4 sm:$0xff]   ;;  %v3572_v51 = vld [vmem:[#allocation5 + $0x180] ss:$16 sps:$4 sm:$0xff]   ;;  %v3574_v53 = vld [vmem:[#allocation5 + $0x1a4] ss:$16 sps:$4 sm:$0xff]  }
  0x5d   :  { %1337 = vmatpush1.bf16.msra.mxu0 %v3524_v18  ;;  %1509 = vmatpush1.bf16.msra.mxu1 %v3525_v19  ;;  %v3573_v52 = vld [vmem:[#allocation5 + $0x188] ss:$16 sps:$4 sm:$0xff]   ;;  %v3576_v54 = vld [vmem:[#allocation5 + $0x1ac] ss:$16 sps:$4 sm:$0xff]   ;;  %v3578_v55 = vld [vmem:[#allocation5 + $0x1a0] ss:$16 sps:$4 sm:$0xff]  }
  0x5e   :  { %1338 = vmatprep.subr.bf16.mxu0 %v3526_v20  ;;  %1510 = vmatprep.subr.bf16.mxu1 %v3528_v21  ;;  %v3579_v56 = vld [vmem:[#allocation5 + $0x1a8] ss:$16 sps:$4 sm:$0xff]   ;;  %v3580_v57 = vld [vmem:[#allocation5 + $0x1c4] ss:$16 sps:$4 sm:$0xff]   ;;  %v3582_v58 = vld [vmem:[#allocation5 + $0x1cc] ss:$16 sps:$4 sm:$0xff]  }
  0x5f   :  { %1360 = vmatprep.mubr.bf16.mxu0 %v3594_v48  ;;  %1532 = vmatprep.mubr.bf16.mxu1 %v3594_v48  ;;  %v3584_v59 = vld [vmem:[#allocation5 + $0x1c0] ss:$16 sps:$4 sm:$0xff]   ;;  %v3585_v60 = vld [vmem:[#allocation5 + $0x1c8] ss:$16 sps:$4 sm:$0xff]   ;;  %v3586_v61 = vld [vmem:[#allocation5 + $0x1e4] ss:$16 sps:$4 sm:$0xff]  }
  0x60   :  { %v3588_v62 = vld [vmem:[#allocation5 + $0x1ec] ss:$16 sps:$4 sm:$0xff]   ;;  %v3590_v63 = vld [vmem:[#allocation5 + $0x1e0] ss:$16 sps:$4 sm:$0xff]   ;;  %v3591_v0 = vld [vmem:[#allocation5 + $0x1e8] ss:$16 sps:$4 sm:$0xff]  }
  0x61   :  { %1339 = vmatpush1.bf16.msra.mxu0 %v3530_v22  ;;  %1511 = vmatpush1.bf16.msra.mxu1 %v3531_v23  ;;  %v3597_v1 = vld [vmem:[#allocation5 + $0x204] ss:$16 sps:$4 sm:$0xff]   ;;  %v3600_v2 = vld [vmem:[#allocation5 + $0x20c] ss:$16 sps:$4 sm:$0xff]   ;;  %v3595_v4 = vld [vmem:[#allocation5 + $0x200] ss:$16 sps:$4 sm:$0xff]  }
  0x62   :  { %1340 = vmatprep.subr.bf16.mxu0 %v3532_v24  ;;  %1512 = vmatprep.subr.bf16.mxu1 %v3534_v25  ;;  %v3592_v3 = vld [vmem:[#allocation2] ss:$28 sps:$4 sm:$0xff]   ;;  %v3606_v7 = vld [vmem:[#allocation5 + $0x22c] ss:$16 sps:$4 sm:$0xff]   ;;  %v3601_v8 = vld [vmem:[#allocation5 + $0x220] ss:$16 sps:$4 sm:$0xff]  }
  0x63   :  { %v3598_v5 = vld [vmem:[#allocation5 + $0x208] ss:$16 sps:$4 sm:$0xff]   ;;  %v3603_v6 = vld [vmem:[#allocation5 + $0x224] ss:$16 sps:$4 sm:$0xff]   ;;  %v3612_v11 = vld [vmem:[#allocation5 + $0x24c] ss:$16 sps:$4 sm:$0xff]  }
  0x64   :  { %v3604_v9 = vld [vmem:[#allocation5 + $0x228] ss:$16 sps:$4 sm:$0xff]   ;;  %v3609_v10 = vld [vmem:[#allocation5 + $0x244] ss:$16 sps:$4 sm:$0xff]   ;;  %v3607_v12 = vld [vmem:[#allocation5 + $0x240] ss:$16 sps:$4 sm:$0xff]  }
  0x65   :  { %1341 = vmatpush1.bf16.msra.mxu0 %v3536_v26  ;;  %1513 = vmatpush1.bf16.msra.mxu1 %v3537_v27  ;;  %v3610_v13 = vld [vmem:[#allocation5 + $0x248] ss:$16 sps:$4 sm:$0xff]   ;;  %v3615_v14 = vld [vmem:[#allocation5 + $0x264] ss:$16 sps:$4 sm:$0xff]   ;;  %v3618_v15 = vld [vmem:[#allocation5 + $0x26c] ss:$16 sps:$4 sm:$0xff]  }
  0x66   :  { %1342 = vmatprep.subr.bf16.mxu0 %v3538_v28  ;;  %1514 = vmatprep.subr.bf16.mxu1 %v3540_v29  ;;  %v3613_v16 = vld [vmem:[#allocation5 + $0x260] ss:$16 sps:$4 sm:$0xff]   ;;  %v3616_v17 = vld [vmem:[#allocation5 + $0x268] ss:$16 sps:$4 sm:$0xff]   ;;  %v3621_v18 = vld [vmem:[#allocation5 + $0x284] ss:$16 sps:$4 sm:$0xff]  }
  0x67   :  { %v3624_v19 = vld [vmem:[#allocation5 + $0x28c] ss:$16 sps:$4 sm:$0xff]   ;;  %v3619_v20 = vld [vmem:[#allocation5 + $0x280] ss:$16 sps:$4 sm:$0xff]   ;;  %v3622_v21 = vld [vmem:[#allocation5 + $0x288] ss:$16 sps:$4 sm:$0xff]  }
  0x68   :  { %v3627_v22 = vld [vmem:[#allocation5 + $0x2a4] ss:$16 sps:$4 sm:$0xff]   ;;  %v3630_v23 = vld [vmem:[#allocation5 + $0x2ac] ss:$16 sps:$4 sm:$0xff]   ;;  %v3625_v24 = vld [vmem:[#allocation5 + $0x2a0] ss:$16 sps:$4 sm:$0xff]  }
  0x69   :  { %1343 = vmatpush1.bf16.msra.mxu0 %v3542_v30  ;;  %1515 = vmatpush1.bf16.msra.mxu1 %v3543_v31  ;;  %v3628_v25 = vld [vmem:[#allocation5 + $0x2a8] ss:$16 sps:$4 sm:$0xff]   ;;  %v3633_v26 = vld [vmem:[#allocation5 + $0x2c4] ss:$16 sps:$4 sm:$0xff]   ;;  %v3636_v27 = vld [vmem:[#allocation5 + $0x2cc] ss:$16 sps:$4 sm:$0xff]  }
  0x6a   :  { %1344 = vmatprep.subr.bf16.mxu0 %v3544_v32  ;;  %1516 = vmatprep.subr.bf16.mxu1 %v3546_v33  ;;  %v3631_v28 = vld [vmem:[#allocation5 + $0x2c0] ss:$16 sps:$4 sm:$0xff]   ;;  %v3634_v29 = vld [vmem:[#allocation5 + $0x2c8] ss:$16 sps:$4 sm:$0xff]   ;;  %v3639_v31 = vld [vmem:[#allocation5 + $0x2e4] ss:$16 sps:$4 sm:$0xff]  }
  0x6b   :  { %v3693_v30 = vld [vmem:[#allocation2 + $0xc] ss:$28 sps:$4 sm:$0xff]   ;;  %v3642_v32 = vld [vmem:[#allocation5 + $0x2ec] ss:$16 sps:$4 sm:$0xff]   ;;  %vm1324_vm0 = vcmask 130048   ;;  %s4153_s8 = smov [#allocation10]  }
  0x6c   :  { %v3637_v33 = vld [vmem:[#allocation5 + $0x2e0] ss:$16 sps:$4 sm:$0xff]   ;;  %v3666_v48 = vld [vmem:[#allocation5 + $0x36c] ss:$16 sps:$4 sm:$0xff]   ;;  %s3010_s9 = sshll.u32 %s4153_s8, 4  ;;  %s3011_s9 = int_to_ptr.vmem [resolvable:$true] %s3010_s9 }
  0x6d   :  { %1345 = vmatpush1.bf16.msra.mxu0 %v3548_v34  ;;  %1517 = vmatpush1.bf16.msra.mxu1 %v3549_v35  ;;  %v3640_v34 = vld [vmem:[#allocation5 + $0x2e8] ss:$16 sps:$4 sm:$0xff]   ;;  %v3645_v35 = vld [vmem:[#allocation5 + $0x304] ss:$16 sps:$4 sm:$0xff]   ;;  %p4117_p5 = scmp.lt.s32.totalorder %s3011_s9, %s3011_s9 }
  0x6e   :  { %1346 = vmatprep.subr.bf16.mxu0 %v3550_v36  ;;  %1518 = vmatprep.subr.bf16.mxu1 %v3552_v37  ;;  %v3648_v36 = vld [vmem:[#allocation5 + $0x30c] ss:$16 sps:$4 sm:$0xff]   ;;  %v3643_v37 = vld [vmem:[#allocation5 + $0x300] ss:$16 sps:$4 sm:$0xff]  }
  0x71   :  { %1347 = vmatpush1.bf16.msra.mxu0 %v3554_v38  ;;  %1519 = vmatpush1.bf16.msra.mxu1 %v3555_v39  ;;  %v3646_v38 = vld [vmem:[#allocation5 + $0x308] ss:$16 sps:$4 sm:$0xff]   ;;  %v3651_v39 = vld [vmem:[#allocation5 + $0x324] ss:$16 sps:$4 sm:$0xff]  }
  0x72   :  { %1348 = vmatprep.subr.bf16.mxu0 %v3556_v40  ;;  %1520 = vmatprep.subr.bf16.mxu1 %v3558_v41  ;;  %v3654_v40 = vld [vmem:[#allocation5 + $0x32c] ss:$16 sps:$4 sm:$0xff]   ;;  %v3649_v41 = vld [vmem:[#allocation5 + $0x320] ss:$16 sps:$4 sm:$0xff]  }
  0x75   :  { %1349 = vmatpush1.bf16.msra.mxu0 %v3560_v42  ;;  %1521 = vmatpush1.bf16.msra.mxu1 %v3561_v43  ;;  %v3652_v42 = vld [vmem:[#allocation5 + $0x328] ss:$16 sps:$4 sm:$0xff]   ;;  %v3657_v43 = vld [vmem:[#allocation5 + $0x344] ss:$16 sps:$4 sm:$0xff]  }
  0x76   :  { %1350 = vmatprep.subr.bf16.mxu0 %v3562_v44  ;;  %1522 = vmatprep.subr.bf16.mxu1 %v3564_v45  ;;  %v3660_v44 = vld [vmem:[#allocation5 + $0x34c] ss:$16 sps:$4 sm:$0xff]   ;;  %v3655_v45 = vld [vmem:[#allocation5 + $0x340] ss:$16 sps:$4 sm:$0xff]  }
  0x79   :  { %1351 = vmatpush1.bf16.msra.mxu0 %v3566_v46  ;;  %1523 = vmatpush1.bf16.msra.mxu1 %v3567_v47  ;;  %v3658_v46 = vld [vmem:[#allocation5 + $0x348] ss:$16 sps:$4 sm:$0xff]   ;;  %v3663_v47 = vld [vmem:[#allocation5 + $0x364] ss:$16 sps:$4 sm:$0xff]  }
  0x7a   :  { %1352 = vmatprep.subr.bf16.mxu0 %v3568_v49  ;;  %1524 = vmatprep.subr.bf16.mxu1 %v3570_v50  ;;  %v3661_v49 = vld [vmem:[#allocation5 + $0x360] ss:$16 sps:$4 sm:$0xff]   ;;  %v3664_v50 = vld [vmem:[#allocation5 + $0x368] ss:$16 sps:$4 sm:$0xff]  }
  0x7d   :  { %1353 = vmatpush1.bf16.msra.mxu0 %v3572_v51  ;;  %1525 = vmatpush1.bf16.msra.mxu1 %v3573_v52  ;;  %v3669_v51 = vld [vmem:[#allocation5 + $0x384] ss:$16 sps:$4 sm:$0xff]   ;;  %v3672_v52 = vld [vmem:[#allocation5 + $0x38c] ss:$16 sps:$4 sm:$0xff]  }
  0x7e   :  { %1354 = vmatprep.subr.bf16.mxu0 %v3574_v53  ;;  %1526 = vmatprep.subr.bf16.mxu1 %v3576_v54  ;;  %v3667_v53 = vld [vmem:[#allocation5 + $0x380] ss:$16 sps:$4 sm:$0xff]   ;;  %v3670_v54 = vld [vmem:[#allocation5 + $0x388] ss:$16 sps:$4 sm:$0xff]  }
  0x81   :  { %1355 = vmatpush1.bf16.msra.mxu0 %v3578_v55  ;;  %1527 = vmatpush1.bf16.msra.mxu1 %v3579_v56  ;;  %v3675_v55 = vld [vmem:[#allocation5 + $0x3a4] ss:$16 sps:$4 sm:$0xff]   ;;  %v3678_v56 = vld [vmem:[#allocation5 + $0x3ac] ss:$16 sps:$4 sm:$0xff]  }
  0x82   :  { %1356 = vmatprep.subr.bf16.mxu0 %v3580_v57  ;;  %1528 = vmatprep.subr.bf16.mxu1 %v3582_v58  ;;  %v3673_v57 = vld [vmem:[#allocation5 + $0x3a0] ss:$16 sps:$4 sm:$0xff]   ;;  %v3676_v58 = vld [vmem:[#allocation5 + $0x3a8] ss:$16 sps:$4 sm:$0xff]  }
  0x85   :  { %1357 = vmatpush1.bf16.msra.mxu0 %v3584_v59  ;;  %1529 = vmatpush1.bf16.msra.mxu1 %v3585_v60  ;;  %v3681_v59 = vld [vmem:[#allocation5 + $0x3c4] ss:$16 sps:$4 sm:$0xff]   ;;  %v3684_v60 = vld [vmem:[#allocation5 + $0x3cc] ss:$16 sps:$4 sm:$0xff]  }
  0x86   :  { %1358 = vmatprep.subr.bf16.mxu0 %v3586_v61  ;;  %1530 = vmatprep.subr.bf16.mxu1 %v3588_v62  ;;  %v3679_v61 = vld [vmem:[#allocation5 + $0x3c0] ss:$16 sps:$4 sm:$0xff]   ;;  %v3682_v62 = vld [vmem:[#allocation5 + $0x3c8] ss:$16 sps:$4 sm:$0xff]  }
  0x89   :  { %1359 = vmatpush1.bf16.msra.mxu0 %v3590_v63  ;;  %1531 = vmatpush1.bf16.msra.mxu1 %v3591_v0  ;;  %v3687_v63 = vld [vmem:[#allocation5 + $0x3e4] ss:$16 sps:$4 sm:$0xff]   ;;  %v3690_v0 = vld [vmem:[#allocation5 + $0x3ec] ss:$16 sps:$4 sm:$0xff]  }
  0x8a   :  { %1371 = vmatprep.subr.bf16.mxu0 %v3597_v1  ;;  %1543 = vmatprep.subr.bf16.mxu1 %v3600_v2  ;;  %v3685_v1 = vld [vmem:[#allocation5 + $0x3e0] ss:$16 sps:$4 sm:$0xff]   ;;  %v3688_v2 = vld [vmem:[#allocation5 + $0x3e8] ss:$16 sps:$4 sm:$0xff]  }
  0x8c   :  { %1361 = vmatmul.mubr.bf16.vlgmr.msra.gmra.mrb[0].mxu0 %v3592_v3  ;;  %1533 = vmatmul.mubr.bf16.vlgmr.msra.gmra.mrb[0].mxu1 %v3592_v3  ;;  %v3696_v3 = vld [vmem:[#allocation5 + $0x404] ss:$16 sps:$4 sm:$0xff]  }
  0x8d   :  { %1372 = vmatpush1.bf16.msra.mxu0 %v3595_v4  ;;  %1544 = vmatpush1.bf16.msra.mxu1 %v3598_v5  ;;  %v3699_v4 = vld [vmem:[#allocation5 + $0x40c] ss:$16 sps:$4 sm:$0xff]  }
  0x8e   :  { %1373 = vmatprep.subr.bf16.mxu0 %v3603_v6  ;;  %1545 = vmatprep.subr.bf16.mxu1 %v3606_v7  ;;  %v3691_v5 = vld [vmem:[#allocation2 + $0x8] ss:$28 sps:$4 sm:$0xff]   ;;  %v3697_v7 = vld [vmem:[#allocation5 + $0x408] ss:$16 sps:$4 sm:$0xff]  }
  0x8f   :  { %1403 = vmatprep.mubr.bf16.mxu0 %v3693_v30  ;;  %1575 = vmatprep.mubr.bf16.mxu1 %v3693_v30  ;;  %v3694_v6 = vld [vmem:[#allocation5 + $0x400] ss:$16 sps:$4 sm:$0xff]   ;;  %v3735_v30 = vld [vmem:[#allocation5 + $0x4cc] ss:$16 sps:$4 sm:$0xff]  }
  0x91   :  { %1374 = vmatpush1.bf16.msra.mxu0 %v3601_v8  ;;  %1546 = vmatpush1.bf16.msra.mxu1 %v3604_v9  ;;  %v3702_v8 = vld [vmem:[#allocation5 + $0x424] ss:$16 sps:$4 sm:$0xff]   ;;  %v3705_v9 = vld [vmem:[#allocation5 + $0x42c] ss:$16 sps:$4 sm:$0xff]  }
  0x92   :  { %1375 = vmatprep.subr.bf16.mxu0 %v3609_v10  ;;  %1547 = vmatprep.subr.bf16.mxu1 %v3612_v11  ;;  %v3700_v10 = vld [vmem:[#allocation5 + $0x420] ss:$16 sps:$4 sm:$0xff]   ;;  %v3703_v11 = vld [vmem:[#allocation5 + $0x428] ss:$16 sps:$4 sm:$0xff]  }
  0x95   :  { %1376 = vmatpush1.bf16.msra.mxu0 %v3607_v12  ;;  %1548 = vmatpush1.bf16.msra.mxu1 %v3610_v13  ;;  %v3792_v12 = vld [vmem:[#allocation2 + $0x14] ss:$28 sps:$4 sm:$0xff]   ;;  %v3708_v13 = vld [vmem:[#allocation5 + $0x444] ss:$16 sps:$4 sm:$0xff]  }
  0x96   :  { %1377 = vmatprep.subr.bf16.mxu0 %v3615_v14  ;;  %1549 = vmatprep.subr.bf16.mxu1 %v3618_v15  ;;  %v3711_v14 = vld [vmem:[#allocation5 + $0x44c] ss:$16 sps:$4 sm:$0xff]   ;;  %v3706_v15 = vld [vmem:[#allocation5 + $0x440] ss:$16 sps:$4 sm:$0xff]  }
  0x99   :  { %1378 = vmatpush1.bf16.msra.mxu0 %v3613_v16  ;;  %1550 = vmatpush1.bf16.msra.mxu1 %v3616_v17  ;;  %v3709_v16 = vld [vmem:[#allocation5 + $0x448] ss:$16 sps:$4 sm:$0xff]   ;;  %v3714_v17 = vld [vmem:[#allocation5 + $0x464] ss:$16 sps:$4 sm:$0xff]  }
  0x9a   :  { %1379 = vmatprep.subr.bf16.mxu0 %v3621_v18  ;;  %1551 = vmatprep.subr.bf16.mxu1 %v3624_v19  ;;  %v3717_v18 = vld [vmem:[#allocation5 + $0x46c] ss:$16 sps:$4 sm:$0xff]   ;;  %v3712_v19 = vld [vmem:[#allocation5 + $0x460] ss:$16 sps:$4 sm:$0xff]  }
  0x9d   :  { %1380 = vmatpush1.bf16.msra.mxu0 %v3619_v20  ;;  %1552 = vmatpush1.bf16.msra.mxu1 %v3622_v21  ;;  %v3715_v20 = vld [vmem:[#allocation5 + $0x468] ss:$16 sps:$4 sm:$0xff]   ;;  %v3720_v21 = vld [vmem:[#allocation5 + $0x484] ss:$16 sps:$4 sm:$0xff]  }
  0x9e   :  { %1381 = vmatprep.subr.bf16.mxu0 %v3627_v22  ;;  %1553 = vmatprep.subr.bf16.mxu1 %v3630_v23  ;;  %v3723_v22 = vld [vmem:[#allocation5 + $0x48c] ss:$16 sps:$4 sm:$0xff]   ;;  %v3718_v23 = vld [vmem:[#allocation5 + $0x480] ss:$16 sps:$4 sm:$0xff]  }
  0xa1   :  { %1382 = vmatpush1.bf16.msra.mxu0 %v3625_v24  ;;  %1554 = vmatpush1.bf16.msra.mxu1 %v3628_v25  ;;  %v3721_v24 = vld [vmem:[#allocation5 + $0x488] ss:$16 sps:$4 sm:$0xff]   ;;  %v3726_v25 = vld [vmem:[#allocation5 + $0x4a4] ss:$16 sps:$4 sm:$0xff]  }
  0xa2   :  { %1383 = vmatprep.subr.bf16.mxu0 %v3633_v26  ;;  %1555 = vmatprep.subr.bf16.mxu1 %v3636_v27  ;;  %v3729_v26 = vld [vmem:[#allocation5 + $0x4ac] ss:$16 sps:$4 sm:$0xff]   ;;  %v3724_v27 = vld [vmem:[#allocation5 + $0x4a0] ss:$16 sps:$4 sm:$0xff]  }
  0xa5   :  { %1384 = vmatpush1.bf16.msra.mxu0 %v3631_v28  ;;  %1556 = vmatpush1.bf16.msra.mxu1 %v3634_v29  ;;  %v3727_v28 = vld [vmem:[#allocation5 + $0x4a8] ss:$16 sps:$4 sm:$0xff]   ;;  %v3732_v29 = vld [vmem:[#allocation5 + $0x4c4] ss:$16 sps:$4 sm:$0xff]  }
  0xa6   :  { %1385 = vmatprep.subr.bf16.mxu0 %v3639_v31  ;;  %1557 = vmatprep.subr.bf16.mxu1 %v3642_v32  ;;  %v3730_v31 = vld [vmem:[#allocation5 + $0x4c0] ss:$16 sps:$4 sm:$0xff]   ;;  %v3733_v32 = vld [vmem:[#allocation5 + $0x4c8] ss:$16 sps:$4 sm:$0xff]  }
  0xa9   :  { %1386 = vmatpush1.bf16.msra.mxu0 %v3637_v33  ;;  %1558 = vmatpush1.bf16.msra.mxu1 %v3640_v34  ;;  %v3738_v33 = vld [vmem:[#allocation5 + $0x4e4] ss:$16 sps:$4 sm:$0xff]   ;;  %v3741_v34 = vld [vmem:[#allocation5 + $0x4ec] ss:$16 sps:$4 sm:$0xff]  }
  0xaa   :  { %1387 = vmatprep.subr.bf16.mxu0 %v3645_v35  ;;  %1559 = vmatprep.subr.bf16.mxu1 %v3648_v36  ;;  %v3736_v35 = vld [vmem:[#allocation5 + $0x4e0] ss:$16 sps:$4 sm:$0xff]   ;;  %v3739_v36 = vld [vmem:[#allocation5 + $0x4e8] ss:$16 sps:$4 sm:$0xff]  }
  0xad   :  { %1388 = vmatpush1.bf16.msra.mxu0 %v3643_v37  ;;  %1560 = vmatpush1.bf16.msra.mxu1 %v3646_v38  ;;  %v3744_v37 = vld [vmem:[#allocation5 + $0x504] ss:$16 sps:$4 sm:$0xff]   ;;  %v3747_v38 = vld [vmem:[#allocation5 + $0x50c] ss:$16 sps:$4 sm:$0xff]  }
  0xae   :  { %1389 = vmatprep.subr.bf16.mxu0 %v3651_v39  ;;  %1561 = vmatprep.subr.bf16.mxu1 %v3654_v40  ;;  %v3742_v39 = vld [vmem:[#allocation5 + $0x500] ss:$16 sps:$4 sm:$0xff]   ;;  %v3745_v40 = vld [vmem:[#allocation5 + $0x508] ss:$16 sps:$4 sm:$0xff]  }
  0xb1   :  { %1390 = vmatpush1.bf16.msra.mxu0 %v3649_v41  ;;  %1562 = vmatpush1.bf16.msra.mxu1 %v3652_v42  ;;  %v3750_v41 = vld [vmem:[#allocation5 + $0x524] ss:$16 sps:$4 sm:$0xff]   ;;  %v3753_v42 = vld [vmem:[#allocation5 + $0x52c] ss:$16 sps:$4 sm:$0xff]  }
  0xb2   :  { %1391 = vmatprep.subr.bf16.mxu0 %v3657_v43  ;;  %1563 = vmatprep.subr.bf16.mxu1 %v3660_v44  ;;  %v3748_v43 = vld [vmem:[#allocation5 + $0x520] ss:$16 sps:$4 sm:$0xff]   ;;  %v3751_v44 = vld [vmem:[#allocation5 + $0x528] ss:$16 sps:$4 sm:$0xff]  }
  0xb5   :  { %1392 = vmatpush1.bf16.msra.mxu0 %v3655_v45  ;;  %1564 = vmatpush1.bf16.msra.mxu1 %v3658_v46  ;;  %v3756_v45 = vld [vmem:[#allocation5 + $0x544] ss:$16 sps:$4 sm:$0xff]   ;;  %v3759_v46 = vld [vmem:[#allocation5 + $0x54c] ss:$16 sps:$4 sm:$0xff]  }
  0xb6   :  { %1393 = vmatprep.subr.bf16.mxu0 %v3663_v47  ;;  %1565 = vmatprep.subr.bf16.mxu1 %v3666_v48  ;;  %v3754_v47 = vld [vmem:[#allocation5 + $0x540] ss:$16 sps:$4 sm:$0xff]   ;;  %v3757_v48 = vld [vmem:[#allocation5 + $0x548] ss:$16 sps:$4 sm:$0xff]  }
  0xb9   :  { %1394 = vmatpush1.bf16.msra.mxu0 %v3661_v49  ;;  %1566 = vmatpush1.bf16.msra.mxu1 %v3664_v50  ;;  %v3762_v49 = vld [vmem:[#allocation5 + $0x564] ss:$16 sps:$4 sm:$0xff]   ;;  %v3765_v50 = vld [vmem:[#allocation5 + $0x56c] ss:$16 sps:$4 sm:$0xff]  }
  0xba   :  { %1395 = vmatprep.subr.bf16.mxu0 %v3669_v51  ;;  %1567 = vmatprep.subr.bf16.mxu1 %v3672_v52  ;;  %v3760_v51 = vld [vmem:[#allocation5 + $0x560] ss:$16 sps:$4 sm:$0xff]   ;;  %v3763_v52 = vld [vmem:[#allocation5 + $0x568] ss:$16 sps:$4 sm:$0xff]  }
  0xbd   :  { %1396 = vmatpush1.bf16.msra.mxu0 %v3667_v53  ;;  %1568 = vmatpush1.bf16.msra.mxu1 %v3670_v54  ;;  %v3768_v53 = vld [vmem:[#allocation5 + $0x584] ss:$16 sps:$4 sm:$0xff]   ;;  %v3771_v54 = vld [vmem:[#allocation5 + $0x58c] ss:$16 sps:$4 sm:$0xff]  }
  0xbe   :  { %1397 = vmatprep.subr.bf16.mxu0 %v3675_v55  ;;  %1569 = vmatprep.subr.bf16.mxu1 %v3678_v56  ;;  %v3766_v55 = vld [vmem:[#allocation5 + $0x580] ss:$16 sps:$4 sm:$0xff]   ;;  %v3769_v56 = vld [vmem:[#allocation5 + $0x588] ss:$16 sps:$4 sm:$0xff]  }
  0xc1   :  { %1398 = vmatpush1.bf16.msra.mxu0 %v3673_v57  ;;  %1570 = vmatpush1.bf16.msra.mxu1 %v3676_v58  ;;  %v3774_v57 = vld [vmem:[#allocation5 + $0x5a4] ss:$16 sps:$4 sm:$0xff]   ;;  %v3777_v58 = vld [vmem:[#allocation5 + $0x5ac] ss:$16 sps:$4 sm:$0xff]  }
  0xc2   :  { %1399 = vmatprep.subr.bf16.mxu0 %v3681_v59  ;;  %1571 = vmatprep.subr.bf16.mxu1 %v3684_v60  ;;  %v3772_v59 = vld [vmem:[#allocation5 + $0x5a0] ss:$16 sps:$4 sm:$0xff]   ;;  %v3775_v60 = vld [vmem:[#allocation5 + $0x5a8] ss:$16 sps:$4 sm:$0xff]  }
  0xc5   :  { %1400 = vmatpush1.bf16.msra.mxu0 %v3679_v61  ;;  %1572 = vmatpush1.bf16.msra.mxu1 %v3682_v62  ;;  %v3780_v61 = vld [vmem:[#allocation5 + $0x5c4] ss:$16 sps:$4 sm:$0xff]   ;;  %v3783_v62 = vld [vmem:[#allocation5 + $0x5cc] ss:$16 sps:$4 sm:$0xff]  }
  0xc6   :  { %1401 = vmatprep.subr.bf16.mxu0 %v3687_v63  ;;  %1573 = vmatprep.subr.bf16.mxu1 %v3690_v0  ;;  %v3778_v63 = vld [vmem:[#allocation5 + $0x5c0] ss:$16 sps:$4 sm:$0xff]   ;;  %v3781_v0 = vld [vmem:[#allocation5 + $0x5c8] ss:$16 sps:$4 sm:$0xff]  }
  0xc9   :  { %1402 = vmatpush1.bf16.msra.mxu0 %v3685_v1  ;;  %1574 = vmatpush1.bf16.msra.mxu1 %v3688_v2  ;;  %v3786_v1 = vld [vmem:[#allocation5 + $0x5e4] ss:$16 sps:$4 sm:$0xff]   ;;  %v3789_v2 = vld [vmem:[#allocation5 + $0x5ec] ss:$16 sps:$4 sm:$0xff]  }
  0xca   :  { %1414 = vmatprep.subr.bf16.mxu0 %v3696_v3  ;;  %1586 = vmatprep.subr.bf16.mxu1 %v3699_v4  ;;  %v3784_v3 = vld [vmem:[#allocation5 + $0x5e0] ss:$16 sps:$4 sm:$0xff]   ;;  %v3787_v4 = vld [vmem:[#allocation5 + $0x5e8] ss:$16 sps:$4 sm:$0xff]  }
  0xcc   :  { %1404 = vmatmul.mubr.bf16.vlgmr.msra.gmra.mrb[0].mxu0 %v3691_v5  ;;  %1576 = vmatmul.mubr.bf16.vlgmr.msra.gmra.mrb[0].mxu1 %v3691_v5  ;;  %v3795_v5 = vld [vmem:[#allocation5 + $0x604] ss:$16 sps:$4 sm:$0xff]  }
  0xcd   :  { %1415 = vmatpush1.bf16.msra.mxu0 %v3694_v6  ;;  %1587 = vmatpush1.bf16.msra.mxu1 %v3697_v7  ;;  %v3798_v6 = vld [vmem:[#allocation5 + $0x60c] ss:$16 sps:$4 sm:$0xff]   ;;  %v3790_v7 = vld [vmem:[#allocation2 + $0x10] ss:$28 sps:$4 sm:$0xff]  }
  0xce   :  { %1416 = vmatprep.subr.bf16.mxu0 %v3702_v8  ;;  %1588 = vmatprep.subr.bf16.mxu1 %v3705_v9  ;;  %v3793_v8 = vld [vmem:[#allocation5 + $0x600] ss:$16 sps:$4 sm:$0xff]   ;;  %v3796_v9 = vld [vmem:[#allocation5 + $0x608] ss:$16 sps:$4 sm:$0xff]  }
  0xcf   :  { %1446 = vmatprep.mubr.bf16.mxu0 %v3792_v12  ;;  %1618 = vmatprep.mubr.bf16.mxu1 %v3792_v12  ;;  %v4152_v12 = vmov 0  }
  0xd1   :  { %1417 = vmatpush1.bf16.msra.mxu0 %v3700_v10  ;;  %1589 = vmatpush1.bf16.msra.mxu1 %v3703_v11  ;;  %v3802_v10 = vld [vmem:[#allocation7 + $0x4] ss:$16 sps:$4 sm:$0xff]   ;;  %v3805_v11 = vld [vmem:[#allocation7 + $0xc] ss:$16 sps:$4 sm:$0xff]  }
  0xd2   :  { %1418 = vmatprep.subr.bf16.mxu0 %v3708_v13  ;;  %1590 = vmatprep.subr.bf16.mxu1 %v3711_v14  ;;  %v3799_v13 = vld [vmem:[#allocation2 + $0x18] ss:$28 sps:$4 sm:$0xff]  }
  0xd3   :  { %v3800_v14 = vld [vmem:[#allocation7] ss:$16 sps:$4 sm:$0xff]  }
  0xd5   :  { %1419 = vmatpush1.bf16.msra.mxu0 %v3706_v15  ;;  %1591 = vmatpush1.bf16.msra.mxu1 %v3709_v16  ;;  %v3803_v15 = vld [vmem:[#allocation7 + $0x8] ss:$16 sps:$4 sm:$0xff]   ;;  %v3808_v16 = vld [vmem:[#allocation7 + $0x24] ss:$16 sps:$4 sm:$0xff]  }
  0xd6   :  { %1420 = vmatprep.subr.bf16.mxu0 %v3714_v17  ;;  %1592 = vmatprep.subr.bf16.mxu1 %v3717_v18  ;;  %v3811_v17 = vld [vmem:[#allocation7 + $0x2c] ss:$16 sps:$4 sm:$0xff]   ;;  %v3806_v18 = vld [vmem:[#allocation7 + $0x20] ss:$16 sps:$4 sm:$0xff]  }
  0xd9   :  { %1421 = vmatpush1.bf16.msra.mxu0 %v3712_v19  ;;  %1593 = vmatpush1.bf16.msra.mxu1 %v3715_v20  ;;  %v3809_v19 = vld [vmem:[#allocation7 + $0x28] ss:$16 sps:$4 sm:$0xff]   ;;  %v3814_v20 = vld [vmem:[#allocation7 + $0x44] ss:$16 sps:$4 sm:$0xff]  }
  0xda   :  { %1422 = vmatprep.subr.bf16.mxu0 %v3720_v21  ;;  %1594 = vmatprep.subr.bf16.mxu1 %v3723_v22  ;;  %v3817_v21 = vld [vmem:[#allocation7 + $0x4c] ss:$16 sps:$4 sm:$0xff]   ;;  %v3812_v22 = vld [vmem:[#allocation7 + $0x40] ss:$16 sps:$4 sm:$0xff]  }
  0xdd   :  { %1423 = vmatpush1.bf16.msra.mxu0 %v3718_v23  ;;  %1595 = vmatpush1.bf16.msra.mxu1 %v3721_v24  ;;  %v3815_v23 = vld [vmem:[#allocation7 + $0x48] ss:$16 sps:$4 sm:$0xff]   ;;  %v3820_v24 = vld [vmem:[#allocation7 + $0x64] ss:$16 sps:$4 sm:$0xff]  }
  0xde   :  { %1424 = vmatprep.subr.bf16.mxu0 %v3726_v25  ;;  %1596 = vmatprep.subr.bf16.mxu1 %v3729_v26  ;;  %v3823_v25 = vld [vmem:[#allocation7 + $0x6c] ss:$16 sps:$4 sm:$0xff]   ;;  %v3818_v26 = vld [vmem:[#allocation7 + $0x60] ss:$16 sps:$4 sm:$0xff]  }
  0xe1   :  { %1425 = vmatpush1.bf16.msra.mxu0 %v3724_v27  ;;  %1597 = vmatpush1.bf16.msra.mxu1 %v3727_v28  ;;  %v3821_v27 = vld [vmem:[#allocation7 + $0x68] ss:$16 sps:$4 sm:$0xff]   ;;  %v3826_v28 = vld [vmem:[#allocation7 + $0x84] ss:$16 sps:$4 sm:$0xff]  }
  0xe2   :  { %1426 = vmatprep.subr.bf16.mxu0 %v3732_v29  ;;  %1598 = vmatprep.subr.bf16.mxu1 %v3735_v30  ;;  %v3829_v29 = vld [vmem:[#allocation7 + $0x8c] ss:$16 sps:$4 sm:$0xff]   ;;  %v3824_v30 = vld [vmem:[#allocation7 + $0x80] ss:$16 sps:$4 sm:$0xff]  }
  0xe5   :  { %1427 = vmatpush1.bf16.msra.mxu0 %v3730_v31  ;;  %1599 = vmatpush1.bf16.msra.mxu1 %v3733_v32  ;;  %v3827_v31 = vld [vmem:[#allocation7 + $0x88] ss:$16 sps:$4 sm:$0xff]   ;;  %v3832_v32 = vld [vmem:[#allocation7 + $0xa4] ss:$16 sps:$4 sm:$0xff]  }
  0xe6   :  { %1428 = vmatprep.subr.bf16.mxu0 %v3738_v33  ;;  %1600 = vmatprep.subr.bf16.mxu1 %v3741_v34  ;;  %v3835_v33 = vld [vmem:[#allocation7 + $0xac] ss:$16 sps:$4 sm:$0xff]   ;;  %v3830_v34 = vld [vmem:[#allocation7 + $0xa0] ss:$16 sps:$4 sm:$0xff]  }
  0xe9   :  { %1429 = vmatpush1.bf16.msra.mxu0 %v3736_v35  ;;  %1601 = vmatpush1.bf16.msra.mxu1 %v3739_v36  ;;  %v3833_v35 = vld [vmem:[#allocation7 + $0xa8] ss:$16 sps:$4 sm:$0xff]   ;;  %v3838_v36 = vld [vmem:[#allocation7 + $0xc4] ss:$16 sps:$4 sm:$0xff]  }
  0xea   :  { %1430 = vmatprep.subr.bf16.mxu0 %v3744_v37  ;;  %1602 = vmatprep.subr.bf16.mxu1 %v3747_v38  ;;  %v3841_v37 = vld [vmem:[#allocation7 + $0xcc] ss:$16 sps:$4 sm:$0xff]   ;;  %v3836_v38 = vld [vmem:[#allocation7 + $0xc0] ss:$16 sps:$4 sm:$0xff]  }
  0xed   :  { %1431 = vmatpush1.bf16.msra.mxu0 %v3742_v39  ;;  %1603 = vmatpush1.bf16.msra.mxu1 %v3745_v40  ;;  %v3839_v39 = vld [vmem:[#allocation7 + $0xc8] ss:$16 sps:$4 sm:$0xff]   ;;  %v3844_v40 = vld [vmem:[#allocation7 + $0xe4] ss:$16 sps:$4 sm:$0xff]  }
  0xee   :  { %1432 = vmatprep.subr.bf16.mxu0 %v3750_v41  ;;  %1604 = vmatprep.subr.bf16.mxu1 %v3753_v42  ;;  %v3847_v41 = vld [vmem:[#allocation7 + $0xec] ss:$16 sps:$4 sm:$0xff]   ;;  %v3842_v42 = vld [vmem:[#allocation7 + $0xe0] ss:$16 sps:$4 sm:$0xff]  }
  0xf1   :  { %1433 = vmatpush1.bf16.msra.mxu0 %v3748_v43  ;;  %1605 = vmatpush1.bf16.msra.mxu1 %v3751_v44  ;;  %v3845_v43 = vld [vmem:[#allocation7 + $0xe8] ss:$16 sps:$4 sm:$0xff]   ;;  %v3850_v44 = vld [vmem:[#allocation7 + $0x104] ss:$16 sps:$4 sm:$0xff]  }
  0xf2   :  { %1434 = vmatprep.subr.bf16.mxu0 %v3756_v45  ;;  %1606 = vmatprep.subr.bf16.mxu1 %v3759_v46  ;;  %v3853_v45 = vld [vmem:[#allocation7 + $0x10c] ss:$16 sps:$4 sm:$0xff]   ;;  %v3848_v46 = vld [vmem:[#allocation7 + $0x100] ss:$16 sps:$4 sm:$0xff]  }
  0xf5   :  { %1435 = vmatpush1.bf16.msra.mxu0 %v3754_v47  ;;  %1607 = vmatpush1.bf16.msra.mxu1 %v3757_v48  ;;  %v3851_v47 = vld [vmem:[#allocation7 + $0x108] ss:$16 sps:$4 sm:$0xff]   ;;  %v3856_v48 = vld [vmem:[#allocation7 + $0x124] ss:$16 sps:$4 sm:$0xff]  }
  0xf6   :  { %1436 = vmatprep.subr.bf16.mxu0 %v3762_v49  ;;  %1608 = vmatprep.subr.bf16.mxu1 %v3765_v50  ;;  %v3859_v49 = vld [vmem:[#allocation7 + $0x12c] ss:$16 sps:$4 sm:$0xff]   ;;  %v3854_v50 = vld [vmem:[#allocation7 + $0x120] ss:$16 sps:$4 sm:$0xff]  }
  0xf9   :  { %1437 = vmatpush1.bf16.msra.mxu0 %v3760_v51  ;;  %1609 = vmatpush1.bf16.msra.mxu1 %v3763_v52  ;;  %v3857_v51 = vld [vmem:[#allocation7 + $0x128] ss:$16 sps:$4 sm:$0xff]   ;;  %v3862_v52 = vld [vmem:[#allocation7 + $0x144] ss:$16 sps:$4 sm:$0xff]  }
  0xfa   :  { %1438 = vmatprep.subr.bf16.mxu0 %v3768_v53  ;;  %1610 = vmatprep.subr.bf16.mxu1 %v3771_v54  ;;  %v3865_v53 = vld [vmem:[#allocation7 + $0x14c] ss:$16 sps:$4 sm:$0xff]   ;;  %v3860_v54 = vld [vmem:[#allocation7 + $0x140] ss:$16 sps:$4 sm:$0xff]  }
  0xfd   :  { %1439 = vmatpush1.bf16.msra.mxu0 %v3766_v55  ;;  %1611 = vmatpush1.bf16.msra.mxu1 %v3769_v56  ;;  %v3863_v55 = vld [vmem:[#allocation7 + $0x148] ss:$16 sps:$4 sm:$0xff]   ;;  %v3868_v56 = vld [vmem:[#allocation7 + $0x164] ss:$16 sps:$4 sm:$0xff]  }
  0xfe   :  { %1440 = vmatprep.subr.bf16.mxu0 %v3774_v57  ;;  %1612 = vmatprep.subr.bf16.mxu1 %v3777_v58  ;;  %v3871_v57 = vld [vmem:[#allocation7 + $0x16c] ss:$16 sps:$4 sm:$0xff]   ;;  %v3866_v58 = vld [vmem:[#allocation7 + $0x160] ss:$16 sps:$4 sm:$0xff]  }
 0x101   :  { %1441 = vmatpush1.bf16.msra.mxu0 %v3772_v59  ;;  %1613 = vmatpush1.bf16.msra.mxu1 %v3775_v60  ;;  %v3869_v59 = vld [vmem:[#allocation7 + $0x168] ss:$16 sps:$4 sm:$0xff]   ;;  %v3874_v60 = vld [vmem:[#allocation7 + $0x184] ss:$16 sps:$4 sm:$0xff]  }
 0x102   :  { %1442 = vmatprep.subr.bf16.mxu0 %v3780_v61  ;;  %1614 = vmatprep.subr.bf16.mxu1 %v3783_v62  ;;  %v3877_v61 = vld [vmem:[#allocation7 + $0x18c] ss:$16 sps:$4 sm:$0xff]   ;;  %v3872_v62 = vld [vmem:[#allocation7 + $0x180] ss:$16 sps:$4 sm:$0xff]  }
 0x105   :  { %1443 = vmatpush1.bf16.msra.mxu0 %v3778_v63  ;;  %1615 = vmatpush1.bf16.msra.mxu1 %v3781_v0  ;;  %v3875_v63 = vld [vmem:[#allocation7 + $0x188] ss:$16 sps:$4 sm:$0xff]   ;;  %v3880_v0 = vld [vmem:[#allocation7 + $0x1a4] ss:$16 sps:$4 sm:$0xff]  }
 0x106   :  { %1444 = vmatprep.subr.bf16.mxu0 %v3786_v1  ;;  %1616 = vmatprep.subr.bf16.mxu1 %v3789_v2  ;;  %v3883_v1 = vld [vmem:[#allocation7 + $0x1ac] ss:$16 sps:$4 sm:$0xff]   ;;  %v3878_v2 = vld [vmem:[#allocation7 + $0x1a0] ss:$16 sps:$4 sm:$0xff]  }
 0x109   :  { %1445 = vmatpush1.bf16.msra.mxu0 %v3784_v3  ;;  %1617 = vmatpush1.bf16.msra.mxu1 %v3787_v4  ;;  %v3881_v3 = vld [vmem:[#allocation7 + $0x1a8] ss:$16 sps:$4 sm:$0xff]   ;;  %v3886_v4 = vld [vmem:[#allocation7 + $0x1c4] ss:$16 sps:$4 sm:$0xff]  }
 0x10a   :  { %1457 = vmatprep.subr.bf16.mxu0 %v3795_v5  ;;  %1629 = vmatprep.subr.bf16.mxu1 %v3798_v6  ;;  %v3889_v5 = vld [vmem:[#allocation7 + $0x1cc] ss:$16 sps:$4 sm:$0xff]   ;;  %v3884_v6 = vld [vmem:[#allocation7 + $0x1c0] ss:$16 sps:$4 sm:$0xff]  }
 0x10c   :  { %1447 = vmatmul.mubr.bf16.vlgmr.msra.gmra.mrb[0].mxu0 %v3790_v7  ;;  %1619 = vmatmul.mubr.bf16.vlgmr.msra.gmra.mrb[0].mxu1 %v3790_v7  ;;  %v3887_v7 = vld [vmem:[#allocation7 + $0x1c8] ss:$16 sps:$4 sm:$0xff]  }
 0x10d   :  { %1458 = vmatpush1.bf16.msra.mxu0 %v3793_v8  ;;  %1630 = vmatpush1.bf16.msra.mxu1 %v3796_v9  ;;  %v3892_v8 = vld [vmem:[#allocation7 + $0x1e4] ss:$16 sps:$4 sm:$0xff]   ;;  %v3895_v9 = vld [vmem:[#allocation7 + $0x1ec] ss:$16 sps:$4 sm:$0xff]  }
 0x10e   :  { %1489 = vmatprep.mubr.bf16.mxu0 %v4152_v12  ;;  %1661 = vmatprep.mubr.bf16.mxu1 %v4152_v12  ;;  %v3898_v12 = vld [vmem:[#allocation7 + $0x204] ss:$16 sps:$4 sm:$0xff]  }
 0x10f   :  { %2474 = vmatprep.subr.bf16.mxu0 %v3802_v10  ;;  %2560 = vmatprep.subr.bf16.mxu1 %v3805_v11  ;;  %v3890_v10 = vld [vmem:[#allocation7 + $0x1e0] ss:$16 sps:$4 sm:$0xff]   ;;  %v3893_v11 = vld [vmem:[#allocation7 + $0x1e8] ss:$16 sps:$4 sm:$0xff]  }
 0x118   :  { %3227 = vmatmul.mubr.msk.bf16.vlgmr.msra.gmra.mrb[0].mxu0 %vm1324_vm0, %v3799_v13  ;;  %3228 = vmatmul.mubr.msk.bf16.vlgmr.msra.gmra.mrb[0].mxu1 %vm1324_vm0, %v3799_v13  ;;  %v3901_v13 = vld [vmem:[#allocation7 + $0x20c] ss:$16 sps:$4 sm:$0xff]  }
 0x119   :  { %2475 = vmatpush1.bf16.msra.mxu0 %v3800_v14  ;;  %2561 = vmatpush1.bf16.msra.mxu1 %v3803_v15  ;;  %v289_v14 = vlaneseq }
 0x11a   :  { %2476 = vmatprep.subr.bf16.mxu0 %v3808_v16  ;;  %2562 = vmatprep.subr.bf16.mxu1 %v3811_v17 }
 0x11b   :  { %v4257_v15 = vshrl.u32 %v289_v14, 7  ;;  %v3935_v14 = vld [vmem:[#allocation7 + $0x2c8] ss:$16 sps:$4 sm:$0xff]  }
 0x11d   :  { %2477 = vmatpush1.bf16.msra.mxu0 %v3806_v18  ;;  %2563 = vmatpush1.bf16.msra.mxu1 %v3809_v19  ;;  %v291_v16 = vsub.s32 0, %v4257_v15  ;;  %v299_v17 = vsub.s32 2, %v4257_v15  ;;  %v287_v18 = vld [vmem:[%s4306_s2] sm:$0xf]  ;;  %v295_v19 = vsub.s32 1, %v4257_v15 }
 0x11e   :  { %2478 = vmatprep.subr.bf16.mxu0 %v3814_v20  ;;  %2564 = vmatprep.subr.bf16.mxu1 %v3817_v21  ;;  %v303_v20 = vsub.s32 3, %v4257_v15 }
 0x11f   :  { %v292_v21 = vrot.slane %v287_v18, %v291_v16 }
 0x121   :  { %2479 = vmatpush1.bf16.msra.mxu0 %v3812_v22  ;;  %2565 = vmatpush1.bf16.msra.mxu1 %v3815_v23  ;;  %v300_v22 = vrot.slane %v287_v18, %v299_v17  ;;  %v296_v23 = vrot.slane %v287_v18, %v295_v19 }
 0x122   :  { %2480 = vmatprep.subr.bf16.mxu0 %v3820_v24  ;;  %2566 = vmatprep.subr.bf16.mxu1 %v3823_v25  ;;  %v304_v24 = vrot.slane %v287_v18, %v303_v20  ;;  %v3940_v18 = vld [vmem:[#allocation7 + $0x2e4] ss:$16 sps:$4 sm:$0xff]  }
 0x125   :  { %2481 = vmatpush1.bf16.msra.mxu0 %v3818_v26  ;;  %2567 = vmatpush1.bf16.msra.mxu1 %v3821_v27 }
 0x126   :  { %2482 = vmatprep.subr.bf16.mxu0 %v3826_v28  ;;  %2568 = vmatprep.subr.bf16.mxu1 %v3829_v29 }
 0x129   :  { %2483 = vmatpush1.bf16.msra.mxu0 %v3824_v30  ;;  %2569 = vmatpush1.bf16.msra.mxu1 %v3827_v31 }
 0x12a   :  { %2484 = vmatprep.subr.bf16.mxu0 %v3832_v32  ;;  %2570 = vmatprep.subr.bf16.mxu1 %v3835_v33 }
 0x12d   :  { %2485 = vmatpush1.bf16.msra.mxu0 %v3830_v34  ;;  %2571 = vmatpush1.bf16.msra.mxu1 %v3833_v35 }
 0x12e   :  { %2486 = vmatprep.subr.bf16.mxu0 %v3838_v36  ;;  %2572 = vmatprep.subr.bf16.mxu1 %v3841_v37 }
 0x131   :  { %2487 = vmatpush1.bf16.msra.mxu0 %v3836_v38  ;;  %2573 = vmatpush1.bf16.msra.mxu1 %v3839_v39 }
 0x132   :  { %2488 = vmatprep.subr.bf16.mxu0 %v3844_v40  ;;  %2574 = vmatprep.subr.bf16.mxu1 %v3847_v41 }
 0x135   :  { %2489 = vmatpush1.bf16.msra.mxu0 %v3842_v42  ;;  %2575 = vmatpush1.bf16.msra.mxu1 %v3845_v43 }
 0x136   :  { %2490 = vmatprep.subr.bf16.mxu0 %v3850_v44  ;;  %2576 = vmatprep.subr.bf16.mxu1 %v3853_v45 }
 0x139   :  { %2491 = vmatpush1.bf16.msra.mxu0 %v3848_v46  ;;  %2577 = vmatpush1.bf16.msra.mxu1 %v3851_v47 }
 0x13a   :  { %2492 = vmatprep.subr.bf16.mxu0 %v3856_v48  ;;  %2578 = vmatprep.subr.bf16.mxu1 %v3859_v49 }
 0x13d   :  { %2493 = vmatpush1.bf16.msra.mxu0 %v3854_v50  ;;  %2579 = vmatpush1.bf16.msra.mxu1 %v3857_v51 }
 0x13e   :  { %2494 = vmatprep.subr.bf16.mxu0 %v3862_v52  ;;  %2580 = vmatprep.subr.bf16.mxu1 %v3865_v53  ;;  %v3896_v53 = vld [vmem:[#allocation7 + $0x200] ss:$16 sps:$4 sm:$0xff]  }
 0x141   :  { %2495 = vmatpush1.bf16.msra.mxu0 %v3860_v54  ;;  %2581 = vmatpush1.bf16.msra.mxu1 %v3863_v55  ;;  %v3899_v54 = vld [vmem:[#allocation7 + $0x208] ss:$16 sps:$4 sm:$0xff]   ;;  %v3904_v55 = vld [vmem:[#allocation7 + $0x224] ss:$16 sps:$4 sm:$0xff]  }
 0x142   :  { %2496 = vmatprep.subr.bf16.mxu0 %v3868_v56  ;;  %2582 = vmatprep.subr.bf16.mxu1 %v3871_v57  ;;  %v3907_v56 = vld [vmem:[#allocation7 + $0x22c] ss:$16 sps:$4 sm:$0xff]   ;;  %v3902_v57 = vld [vmem:[#allocation7 + $0x220] ss:$16 sps:$4 sm:$0xff]  }
 0x145   :  { %2497 = vmatpush1.bf16.msra.mxu0 %v3866_v58  ;;  %2583 = vmatpush1.bf16.msra.mxu1 %v3869_v59  ;;  %v3905_v58 = vld [vmem:[#allocation7 + $0x228] ss:$16 sps:$4 sm:$0xff]   ;;  %v3910_v59 = vld [vmem:[#allocation7 + $0x244] ss:$16 sps:$4 sm:$0xff]  }
 0x146   :  { %2498 = vmatprep.subr.bf16.mxu0 %v3874_v60  ;;  %2584 = vmatprep.subr.bf16.mxu1 %v3877_v61  ;;  %v3913_v60 = vld [vmem:[#allocation7 + $0x24c] ss:$16 sps:$4 sm:$0xff]   ;;  %v3908_v61 = vld [vmem:[#allocation7 + $0x240] ss:$16 sps:$4 sm:$0xff]  }
 0x149   :  { %2499 = vmatpush1.bf16.msra.mxu0 %v3872_v62  ;;  %2585 = vmatpush1.bf16.msra.mxu1 %v3875_v63  ;;  %v3911_v62 = vld [vmem:[#allocation7 + $0x248] ss:$16 sps:$4 sm:$0xff]   ;;  %v3916_v63 = vld [vmem:[#allocation7 + $0x264] ss:$16 sps:$4 sm:$0xff]  }
 0x14a   :  { %2500 = vmatprep.subr.bf16.mxu0 %v3880_v0  ;;  %2586 = vmatprep.subr.bf16.mxu1 %v3883_v1  ;;  %v3919_v0 = vld [vmem:[#allocation7 + $0x26c] ss:$16 sps:$4 sm:$0xff]   ;;  %v3914_v1 = vld [vmem:[#allocation7 + $0x260] ss:$16 sps:$4 sm:$0xff]  }
 0x14d   :  { %2501 = vmatpush1.bf16.msra.mxu0 %v3878_v2  ;;  %2587 = vmatpush1.bf16.msra.mxu1 %v3881_v3  ;;  %v3917_v2 = vld [vmem:[#allocation7 + $0x268] ss:$16 sps:$4 sm:$0xff]   ;;  %v3922_v3 = vld [vmem:[#allocation7 + $0x284] ss:$16 sps:$4 sm:$0xff]  }
 0x14e   :  { %2502 = vmatprep.subr.bf16.mxu0 %v3886_v4  ;;  %2588 = vmatprep.subr.bf16.mxu1 %v3889_v5  ;;  %v3925_v4 = vld [vmem:[#allocation7 + $0x28c] ss:$16 sps:$4 sm:$0xff]   ;;  %v3920_v5 = vld [vmem:[#allocation7 + $0x280] ss:$16 sps:$4 sm:$0xff]  }
 0x151   :  { %2503 = vmatpush1.bf16.msra.mxu0 %v3884_v6  ;;  %2589 = vmatpush1.bf16.msra.mxu1 %v3887_v7  ;;  %v3923_v6 = vld [vmem:[#allocation7 + $0x288] ss:$16 sps:$4 sm:$0xff]   ;;  %v3928_v7 = vld [vmem:[#allocation7 + $0x2a4] ss:$16 sps:$4 sm:$0xff]  }
 0x152   :  { %2504 = vmatprep.subr.bf16.mxu0 %v3892_v8  ;;  %2590 = vmatprep.subr.bf16.mxu1 %v3895_v9  ;;  %v3931_v8 = vld [vmem:[#allocation7 + $0x2ac] ss:$16 sps:$4 sm:$0xff]   ;;  %v3926_v9 = vld [vmem:[#allocation7 + $0x2a0] ss:$16 sps:$4 sm:$0xff]  }
 0x155   :  { %2505 = vmatpush1.bf16.msra.mxu0 %v3890_v10  ;;  %2591 = vmatpush1.bf16.msra.mxu1 %v3893_v11  ;;  %v3929_v10 = vld [vmem:[#allocation7 + $0x2a8] ss:$16 sps:$4 sm:$0xff]   ;;  %v3934_v11 = vld [vmem:[#allocation7 + $0x2c4] ss:$16 sps:$4 sm:$0xff]  }
 0x156   :  { %2517 = vmatprep.subr.bf16.mxu0 %v3898_v12  ;;  %2603 = vmatprep.subr.bf16.mxu1 %v3901_v13  ;;  %v3937_v12 = vld [vmem:[#allocation7 + $0x2cc] ss:$16 sps:$4 sm:$0xff]   ;;  %v3932_v13 = vld [vmem:[#allocation7 + $0x2c0] ss:$16 sps:$4 sm:$0xff]  }
 0x1eb   :  { %v1491_v25 = vpop.f32.mrb[0].mxu0  ;;  %v1663_v26 = vpop.f32.mrb[0].mxu1 }
 0x1ec   :  { %v3434_v27 = vadd.f32 %v1491_v25, %v292_v21  ;;  %v3438_v28 = vadd.f32 %v1663_v26, %v300_v22  ;;  %v1493_v29 = vpop.f32.mrb[1].mxu0  ;;  %v1665_v30 = vpop.f32.mrb[1].mxu1  ;;  %v3949_v25 = vld [vmem:[#allocation7 + $0x30c] ss:$16 sps:$4 sm:$0xff]   ;;  %v3944_v26 = vld [vmem:[#allocation7 + $0x300] ss:$16 sps:$4 sm:$0xff]  }
 0x1ed   :  { %v3435_v31 = vadd.f32 %v1493_v29, %v296_v23  ;;  %v3439_v32 = vadd.f32 %v1665_v30, %v304_v24  ;;  %v1495_v33 = vpop.f32.mrb[2].mxu0  ;;  %v1667_v34 = vpop.f32.mrb[2].mxu1  ;;  %v3955_v29 = vld [vmem:[#allocation7 + $0x32c] ss:$16 sps:$4 sm:$0xff]   ;;  %v3950_v30 = vld [vmem:[#allocation7 + $0x320] ss:$16 sps:$4 sm:$0xff]  }
 0x1ee   :  { %v3436_v35 = vadd.f32 %v1495_v33, %v292_v21  ;;  %v3440_v36 = vadd.f32 %v1667_v34, %v300_v22  ;;  %v1497_v37 = vpop.f32.mrb[3].mxu0  ;;  %v1669_v38 = vpop.f32.mrb[3].mxu1  ;;  %v1672_v41 = vmax.f32 %v3434_v27, 0.0  ;;  %v1674_v42 = vmax.f32 %v3438_v28, 0.0  ;;  %v3943_v21 = vld [vmem:[#allocation7 + $0x2ec] ss:$16 sps:$4 sm:$0xff]  }
 0x1ef   :  { %v3437_v39 = vadd.f32 %v1497_v37, %v296_v23  ;;  %v3441_v40 = vadd.f32 %v1669_v38, %v304_v24  ;;  %v1673_v45 = vmax.f32 %v3435_v31, 0.0  ;;  %v1675_v46 = vmax.f32 %v3439_v32, 0.0  ;;  %v3938_v22 = vld [vmem:[#allocation7 + $0x2e0] ss:$16 sps:$4 sm:$0xff]   ;;  %v3941_v23 = vld [vmem:[#allocation7 + $0x2e8] ss:$16 sps:$4 sm:$0xff]  }
 0x1f0   :  { %v1676_v43 = vmax.f32 %v3436_v35, 0.0  ;;  %v1678_v44 = vmax.f32 %v3440_v36, 0.0  ;;  %v3946_v24 = vld [vmem:[#allocation7 + $0x304] ss:$16 sps:$4 sm:$0xff]   ;;  %v3947_v27 = vld [vmem:[#allocation7 + $0x308] ss:$16 sps:$4 sm:$0xff]  }
 0x1f1   :  { %v1677_v47 = vmax.f32 %v3437_v39, 0.0  ;;  %v1679_v48 = vmax.f32 %v3441_v40, 0.0  ;;  %v3952_v28 = vld [vmem:[#allocation7 + $0x324] ss:$16 sps:$4 sm:$0xff]   ;;  %v3953_v31 = vld [vmem:[#allocation7 + $0x328] ss:$16 sps:$4 sm:$0xff]  }
 0x1f2   :  { %v1680_v49 = vpack.c.bf16 %v1676_v43, %v1672_v41  ;;  %v4274_v50 = vpack.c.bf16 %v1678_v44, %v1674_v42  ;;  %v3958_v32 = vld [vmem:[#allocation7 + $0x344] ss:$16 sps:$4 sm:$0xff]   ;;  %v3961_v33 = vld [vmem:[#allocation7 + $0x34c] ss:$16 sps:$4 sm:$0xff]   ;;  %v3956_v34 = vld [vmem:[#allocation7 + $0x340] ss:$16 sps:$4 sm:$0xff]  }
 0x1f3   :  { %v1681_v51 = vpack.c.bf16 %v1677_v47, %v1673_v45  ;;  %v1683_v52 = vpack.c.bf16 %v1679_v48, %v1675_v46  ;;  %v3959_v35 = vld [vmem:[#allocation7 + $0x348] ss:$16 sps:$4 sm:$0xff]   ;;  %v3964_v36 = vld [vmem:[#allocation7 + $0x364] ss:$16 sps:$4 sm:$0xff]   ;;  %v3967_v37 = vld [vmem:[#allocation7 + $0x36c] ss:$16 sps:$4 sm:$0xff]  }
 0x1f4   :  { %v3962_v38 = vld [vmem:[#allocation7 + $0x360] ss:$16 sps:$4 sm:$0xff]   ;;  %v3965_v39 = vld [vmem:[#allocation7 + $0x368] ss:$16 sps:$4 sm:$0xff]   ;;  %v3970_v40 = vld [vmem:[#allocation7 + $0x384] ss:$16 sps:$4 sm:$0xff]  }
 0x1f5   :  { %2506 = vmatprep.mubr.bf16.mxu0 %v1681_v51  ;;  %2592 = vmatprep.mubr.bf16.mxu1 %v1681_v51  ;;  %v3973_v41 = vld [vmem:[#allocation7 + $0x38c] ss:$16 sps:$4 sm:$0xff]   ;;  %v3968_v42 = vld [vmem:[#allocation7 + $0x380] ss:$16 sps:$4 sm:$0xff]   ;;  %v3971_v43 = vld [vmem:[#allocation7 + $0x388] ss:$16 sps:$4 sm:$0xff]  }
 0x1f6   :  { %2507 = vmatmul.mubr.bf16.vlgmr.msra.gmra.mrb[4].mxu0 %v1680_v49  ;;  %2593 = vmatmul.mubr.bf16.vlgmr.msra.gmra.mrb[4].mxu1 %v1680_v49  ;;  %v3976_v44 = vld [vmem:[#allocation7 + $0x3a4] ss:$16 sps:$4 sm:$0xff]   ;;  %v3979_v45 = vld [vmem:[#allocation7 + $0x3ac] ss:$16 sps:$4 sm:$0xff]   ;;  %v3974_v46 = vld [vmem:[#allocation7 + $0x3a0] ss:$16 sps:$4 sm:$0xff]  }
 0x1f7   :  { %2518 = vmatpush1.bf16.msra.mxu0 %v3896_v53  ;;  %2604 = vmatpush1.bf16.msra.mxu1 %v3899_v54  ;;  %v3977_v47 = vld [vmem:[#allocation7 + $0x3a8] ss:$16 sps:$4 sm:$0xff]   ;;  %v3982_v48 = vld [vmem:[#allocation7 + $0x3c4] ss:$16 sps:$4 sm:$0xff]   ;;  %v3985_v49 = vld [vmem:[#allocation7 + $0x3cc] ss:$16 sps:$4 sm:$0xff]  }
 0x1f8   :  { %2549 = vmatprep.mubr.bf16.mxu0 %v1683_v52  ;;  %2635 = vmatprep.mubr.bf16.mxu1 %v1683_v52  ;;  %v3980_v51 = vld [vmem:[#allocation7 + $0x3c0] ss:$16 sps:$4 sm:$0xff]   ;;  %v3983_v52 = vld [vmem:[#allocation7 + $0x3c8] ss:$16 sps:$4 sm:$0xff]   ;;  %v3988_v53 = vld [vmem:[#allocation7 + $0x3e4] ss:$16 sps:$4 sm:$0xff]  }
 0x1f9   :  { %2519 = vmatprep.subr.bf16.mxu0 %v3904_v55  ;;  %2605 = vmatprep.subr.bf16.mxu1 %v3907_v56  ;;  %v3991_v54 = vld [vmem:[#allocation7 + $0x3ec] ss:$16 sps:$4 sm:$0xff]   ;;  %v3986_v55 = vld [vmem:[#allocation7 + $0x3e0] ss:$16 sps:$4 sm:$0xff]   ;;  %v3989_v56 = vld [vmem:[#allocation7 + $0x3e8] ss:$16 sps:$4 sm:$0xff]  }
 0x1fb   :  { %2520 = vmatpush1.bf16.msra.mxu0 %v3902_v57  ;;  %2606 = vmatpush1.bf16.msra.mxu1 %v3905_v58  ;;  %v3992_v57 = vld [vmem:[#allocation8 + $0x40] sm:$0xff]  }
 0x1fc   :  { %2521 = vmatprep.subr.bf16.mxu0 %v3910_v59  ;;  %2607 = vmatprep.subr.bf16.mxu1 %v3913_v60  ;;  %v3993_v58 = vld [vmem:[#allocation8 + $0xc0] sm:$0xff]  }
 0x1fd   :  { %v3994_v59 = vld [vmem:[#allocation8] sm:$0xff]  }
 0x1fe   :  { %v3995_v60 = vld [vmem:[#allocation8 + $0x80] sm:$0xff]  }
 0x1ff   :  { %2522 = vmatpush1.bf16.msra.mxu0 %v3908_v61  ;;  %2608 = vmatpush1.bf16.msra.mxu1 %v3911_v62  ;;  %v3996_v61 = vld [vmem:[#allocation8 + $0x48] sm:$0xff]  }
 0x200   :  { %2523 = vmatprep.subr.bf16.mxu0 %v3916_v63  ;;  %2609 = vmatprep.subr.bf16.mxu1 %v3919_v0  ;;  %v3997_v62 = vld [vmem:[#allocation8 + $0xc8] sm:$0xff]  }
 0x201   :  { %v3998_v63 = vld [vmem:[#allocation8 + $0x8] sm:$0xff]  }
 0x202   :  { %v3999_v0 = vld [vmem:[#allocation8 + $0x88] sm:$0xff]  }
 0x203   :  { %2524 = vmatpush1.bf16.msra.mxu0 %v3914_v1  ;;  %2610 = vmatpush1.bf16.msra.mxu1 %v3917_v2  ;;  %v4000_v1 = vld [vmem:[#allocation8 + $0x50] sm:$0xff]  }
 0x204   :  { %2525 = vmatprep.subr.bf16.mxu0 %v3922_v3  ;;  %2611 = vmatprep.subr.bf16.mxu1 %v3925_v4  ;;  %v4001_v2 = vld [vmem:[#allocation8 + $0xd0] sm:$0xff]  }
 0x205   :  { %v4002_v3 = vld [vmem:[#allocation8 + $0x10] sm:$0xff]  }
 0x206   :  { %v4003_v4 = vld [vmem:[#allocation8 + $0x90] sm:$0xff]  }
 0x207   :  { %2526 = vmatpush1.bf16.msra.mxu0 %v3920_v5  ;;  %2612 = vmatpush1.bf16.msra.mxu1 %v3923_v6  ;;  %v4004_v5 = vld [vmem:[#allocation8 + $0x58] sm:$0xff]  }
 0x208   :  { %2527 = vmatprep.subr.bf16.mxu0 %v3928_v7  ;;  %2613 = vmatprep.subr.bf16.mxu1 %v3931_v8  ;;  %v4005_v6 = vld [vmem:[#allocation8 + $0xd8] sm:$0xff]   ;;  %v4008_v8 = vld [vmem:[#allocation8 + $0x60] sm:$0xff]  }
 0x209   :  { %v4006_v7 = vld [vmem:[#allocation8 + $0x18] sm:$0xff]  }
 0x20b   :  { %2528 = vmatpush1.bf16.msra.mxu0 %v3926_v9  ;;  %2614 = vmatpush1.bf16.msra.mxu1 %v3929_v10  ;;  %v4009_v9 = vld [vmem:[#allocation8 + $0xe0] sm:$0xff]  }
 0x20c   :  { %2529 = vmatprep.subr.bf16.mxu0 %v3934_v11  ;;  %2615 = vmatprep.subr.bf16.mxu1 %v3937_v12  ;;  %v4010_v10 = vld [vmem:[#allocation8 + $0x20] sm:$0xff]   ;;  %v4012_v12 = vld [vmem:[#allocation8 + $0x68] sm:$0xff]  }
 0x20d   :  { %v4011_v11 = vld [vmem:[#allocation8 + $0xa0] sm:$0xff]  }
 0x20f   :  { %2530 = vmatpush1.bf16.msra.mxu0 %v3932_v13  ;;  %2616 = vmatpush1.bf16.msra.mxu1 %v3935_v14  ;;  %v4013_v13 = vld [vmem:[#allocation8 + $0xe8] sm:$0xff]  }
 0x210   :  { %2531 = vmatprep.subr.bf16.mxu0 %v3940_v18  ;;  %2617 = vmatprep.subr.bf16.mxu1 %v3943_v21  ;;  %v4014_v14 = vld [vmem:[#allocation8 + $0x28] sm:$0xff]   ;;  %v4016_v21 = vld [vmem:[#allocation8 + $0x70] sm:$0xff]  }
 0x211   :  { %v4015_v18 = vld [vmem:[#allocation8 + $0xa8] sm:$0xff]  }
 0x213   :  { %2532 = vmatpush1.bf16.msra.mxu0 %v3938_v22  ;;  %2618 = vmatpush1.bf16.msra.mxu1 %v3941_v23  ;;  %v4017_v22 = vld [vmem:[#allocation8 + $0xf0] sm:$0xff]  }
 0x214   :  { %2533 = vmatprep.subr.bf16.mxu0 %v3946_v24  ;;  %2619 = vmatprep.subr.bf16.mxu1 %v3949_v25  ;;  %v4018_v23 = vld [vmem:[#allocation8 + $0x30] sm:$0xff]   ;;  %v4020_v25 = vld [vmem:[#allocation8 + $0x78] sm:$0xff]  }
 0x215   :  { %v4019_v24 = vld [vmem:[#allocation8 + $0xb0] sm:$0xff]  }
 0x217   :  { %2534 = vmatpush1.bf16.msra.mxu0 %v3944_v26  ;;  %2620 = vmatpush1.bf16.msra.mxu1 %v3947_v27  ;;  %v4021_v26 = vld [vmem:[#allocation8 + $0xf8] sm:$0xff]  }
 0x218   :  { %2535 = vmatprep.subr.bf16.mxu0 %v3952_v28  ;;  %2621 = vmatprep.subr.bf16.mxu1 %v3955_v29  ;;  %v4022_v27 = vld [vmem:[#allocation8 + $0x38] sm:$0xff]   ;;  %v1812_v29 = vld [vmem:[%s4308_s4] sm:$0xf] }
 0x219   :  { %v4023_v28 = vld [vmem:[#allocation8 + $0xb8] sm:$0xff]  }
 0x21b   :  { %2536 = vmatpush1.bf16.msra.mxu0 %v3950_v30  ;;  %2622 = vmatpush1.bf16.msra.mxu1 %v3953_v31  ;;  %v1817_v30 = vrot.slane %v1812_v29, %v291_v16  ;;  %v1825_v31 = vrot.slane %v1812_v29, %v299_v17 }
 0x21c   :  { %2537 = vmatprep.subr.bf16.mxu0 %v3958_v32  ;;  %2623 = vmatprep.subr.bf16.mxu1 %v3961_v33  ;;  %v1821_v32 = vrot.slane %v1812_v29, %v295_v19  ;;  %v1829_v33 = vrot.slane %v1812_v29, %v303_v20 }
 0x21f   :  { %2538 = vmatpush1.bf16.msra.mxu0 %v3956_v34  ;;  %2624 = vmatpush1.bf16.msra.mxu1 %v3959_v35 }
 0x220   :  { %2539 = vmatprep.subr.bf16.mxu0 %v3964_v36  ;;  %2625 = vmatprep.subr.bf16.mxu1 %v3967_v37 }
 0x223   :  { %2540 = vmatpush1.bf16.msra.mxu0 %v3962_v38  ;;  %2626 = vmatpush1.bf16.msra.mxu1 %v3965_v39 }
 0x224   :  { %2541 = vmatprep.subr.bf16.mxu0 %v3970_v40  ;;  %2627 = vmatprep.subr.bf16.mxu1 %v3973_v41 }
 0x227   :  { %2542 = vmatpush1.bf16.msra.mxu0 %v3968_v42  ;;  %2628 = vmatpush1.bf16.msra.mxu1 %v3971_v43 }
 0x228   :  { %2543 = vmatprep.subr.bf16.mxu0 %v3976_v44  ;;  %2629 = vmatprep.subr.bf16.mxu1 %v3979_v45 }
 0x22b   :  { %2544 = vmatpush1.bf16.msra.mxu0 %v3974_v46  ;;  %2630 = vmatpush1.bf16.msra.mxu1 %v3977_v47 }
 0x22c   :  { %2545 = vmatprep.subr.bf16.mxu0 %v3982_v48  ;;  %2631 = vmatprep.subr.bf16.mxu1 %v3985_v49 }
 0x22f   :  { %2546 = vmatpush1.bf16.msra.mxu0 %v3980_v51  ;;  %2632 = vmatpush1.bf16.msra.mxu1 %v3983_v52 }
 0x230   :  { %2547 = vmatprep.subr.bf16.mxu0 %v3988_v53  ;;  %2633 = vmatprep.subr.bf16.mxu1 %v3991_v54 }
 0x233   :  { %2548 = vmatpush1.bf16.msra.mxu0 %v3986_v55  ;;  %2634 = vmatpush1.bf16.msra.mxu1 %v3989_v56 }
 0x234   :  { %3390 = vmatprep.subr.bf16.mxu0 %v3992_v57  ;;  %3412 = vmatprep.subr.bf16.mxu1 %v3993_v58 }
 0x236   :  { %2550 = vmatmul.mubr.bf16.vlgmr.msra.gmra.mrb[4].mxu0 %v4274_v50  ;;  %2636 = vmatmul.mubr.bf16.vlgmr.msra.gmra.mrb[4].mxu1 %v4274_v50  ;;  %v4007_v50 = vld [vmem:[#allocation8 + $0x98] sm:$0xff]  }
 0x237   :  { %3391 = vmatpush3.bf16.msra.mxu0 %v3994_v59  ;;  %3413 = vmatpush3.bf16.msra.mxu1 %v3995_v60  ;;  %v3357_v60 = vld [vmem:[%s4310_s6] ss:$0 sm:$0xff]  ;;  %s4112_s6 = scalar_lea.vmem %s3011_s9, 256 }
 0x238   :  { %3392 = vmatprep.subr.bf16.mxu0 %v3996_v61  ;;  %3414 = vmatprep.subr.bf16.mxu1 %v3997_v62  ;;  %p4113_p4 = scmp.ne.s32.totalorder %s3011_s9, %s4112_s6  ;;  %p4118_p6 = scmp.lt.s32.totalorder %s4112_s6, %s4112_s6 }
 0x23a   :  { %p4119_p7 = por %p4118_p6, %p4117_p5 }
 0x23b   :  { %3393 = vmatpush3.bf16.msra.mxu0 %v3998_v63  ;;  %3415 = vmatpush3.bf16.msra.mxu1 %v3999_v0 }
 0x23c   :  { %3394 = vmatprep.subr.bf16.mxu0 %v4000_v1  ;;  %3416 = vmatprep.subr.bf16.mxu1 %v4001_v2  ;;  %p4120_p8 = pnand %p4119_p7, %p4113_p4 }
 0x23f   :  { %3395 = vmatpush3.bf16.msra.mxu0 %v4002_v3  ;;  %3417 = vmatpush3.bf16.msra.mxu1 %v4003_v4 }
 0x240   :  { %3396 = vmatprep.subr.bf16.mxu0 %v4004_v5  ;;  %3418 = vmatprep.subr.bf16.mxu1 %v4005_v6 }
 0x243   :  { %3397 = vmatpush3.bf16.msra.mxu0 %v4006_v7  ;;  %3419 = vmatpush3.bf16.msra.mxu1 %v4007_v50 }
 0x244   :  { %3398 = vmatprep.subr.bf16.mxu0 %v4008_v8  ;;  %3420 = vmatprep.subr.bf16.mxu1 %v4009_v9 }
 0x247   :  { %3399 = vmatpush3.bf16.msra.mxu0 %v4010_v10  ;;  %3421 = vmatpush3.bf16.msra.mxu1 %v4011_v11 }
 0x248   :  { %3400 = vmatprep.subr.bf16.mxu0 %v4012_v12  ;;  %3422 = vmatprep.subr.bf16.mxu1 %v4013_v13 }
 0x24b   :  { %3401 = vmatpush3.bf16.msra.mxu0 %v4014_v14  ;;  %3423 = vmatpush3.bf16.msra.mxu1 %v4015_v18 }
 0x24c   :  { %3402 = vmatprep.subr.bf16.mxu0 %v4016_v21  ;;  %3424 = vmatprep.subr.bf16.mxu1 %v4017_v22 }
 0x24f   :  { %3403 = vmatpush3.bf16.msra.mxu0 %v4018_v23  ;;  %3425 = vmatpush3.bf16.msra.mxu1 %v4019_v24 }
 0x250   :  { %3404 = vmatprep.subr.bf16.mxu0 %v4020_v25  ;;  %3426 = vmatprep.subr.bf16.mxu1 %v4021_v26 }
 0x253   :  { %3405 = vmatpush3.bf16.msra.mxu0 %v4022_v27  ;;  %3427 = vmatpush3.bf16.msra.mxu1 %v4023_v28 }
 0x309   :  { %v2551_v34 = vpop.f32.mrb[4].mxu0  ;;  %v2637_v35 = vpop.f32.mrb[4].mxu1 }
 0x30a   :  { %v3442_v36 = vadd.f32 %v2551_v34, %v1817_v30  ;;  %v3446_v37 = vadd.f32 %v2637_v35, %v1825_v31  ;;  %v2553_v38 = vpop.f32.mrb[5].mxu0  ;;  %v2639_v39 = vpop.f32.mrb[5].mxu1 }
 0x30b   :  { %v3443_v40 = vadd.f32 %v2553_v38, %v1821_v32  ;;  %v3447_v41 = vadd.f32 %v2639_v39, %v1829_v33  ;;  %v2555_v42 = vpop.f32.mrb[6].mxu0  ;;  %v2641_v43 = vpop.f32.mrb[6].mxu1 }
 0x30c   :  { %v3444_v16 = vadd.f32 %v2555_v42, %v1817_v30  ;;  %v3448_v44 = vadd.f32 %v2641_v43, %v1825_v31  ;;  %v2557_v45 = vpop.f32.mrb[7].mxu0  ;;  %v2643_v17 = vpop.f32.mrb[7].mxu1  ;;  %v2646_v19 = vmax.f32 %v3442_v36, 0.0  ;;  %v2648_v48 = vmax.f32 %v3446_v37, 0.0 }
 0x30d   :  { %v3445_v46 = vadd.f32 %v2557_v45, %v1821_v32  ;;  %v3449_v47 = vadd.f32 %v2643_v17, %v1829_v33  ;;  %v2647_v49 = vmax.f32 %v3443_v40, 0.0  ;;  %v2649_v51 = vmax.f32 %v3447_v41, 0.0 }
 0x30e   :  { %v2650_v15 = vmax.f32 %v3444_v16, 0.0  ;;  %v2652_v20 = vmax.f32 %v3448_v44, 0.0 }
 0x30f   :  { %v2651_v52 = vmax.f32 %v3445_v46, 0.0  ;;  %v2653_v53 = vmax.f32 %v3449_v47, 0.0 }
 0x310   :  { %v2654_v54 = vpack.c.bf16 %v2650_v15, %v2646_v19  ;;  %v2656_v55 = vpack.c.bf16 %v2652_v20, %v2648_v48 }
 0x311   :  { %v2655_v56 = vpack.c.bf16 %v2651_v52, %v2647_v49  ;;  %v2657_v57 = vpack.c.bf16 %v2653_v53, %v2649_v51 }
 0x313   :  { %2953 = vmatprep.mubr.bf16.mxu0 %v2655_v56  ;;  %2994 = vmatprep.mubr.bf16.mxu1 %v2657_v57 }
 0x314   :  { %2954 = vmatmul.mubr.bf16.vlgmr.msra.gmra.mrb[8].mxu0 %v2654_v54  ;;  %2995 = vmatmul.mubr.bf16.vlgmr.msra.gmra.mrb[8].mxu1 %v2656_v55 }
 0x3e7   :  { %v3406_v58 = vpop.f32.mrb[8].mxu0  ;;  %v3428_v59 = vpop.f32.mrb[8].mxu1 }
 0x3e8   :  { %v3407_v61 = vpop.f32.mrb[9].mxu0  ;;  %v3429_v62 = vpop.f32.mrb[9].mxu1 }
 0x3e9   :  { %v3408_v63 = vadd.f32 %v3407_v61, %v3406_v58  ;;  %v3430_v0 = vadd.f32 %v3429_v62, %v3428_v59  ;;  %v3409_v1 = vpop.f32.mrb[10].mxu0  ;;  %v3431_v2 = vpop.f32.mrb[10].mxu1 }
 0x3ea   :  { %v3410_v3 = vpop.f32.mrb[11].mxu0  ;;  %v3432_v4 = vpop.f32.mrb[11].mxu1 }
 0x3eb   :  { %v2956_v5 = vadd.f32 %v3408_v63, %v3357_v60  ;;  %v3411_v6 = vadd.f32 %v3410_v3, %v3409_v1  ;;  %v3433_v7 = vadd.f32 %v3432_v4, %v3431_v2 }
 0x3ed   :  { %v2997_v50 = vadd.f32 %v3430_v0, %v2956_v5  ;;  %v2959_v8 = vadd.f32 %v3411_v6, %v3357_v60 }
 0x3ef   :  { %3003 = vst [vmem:[#allocation10] sm:$0xff] %v2997_v50  ;;  %v3000_v9 = vadd.f32 %v3433_v7, %v2959_v8 }
 0x3f1   :  { %3004 = vst [vmem:[#allocation10 + $0x8] sm:$0xff] %v3000_v9 }
 0x3f2   :  { %4123 = shalt.err (!%p4120_p8)
}
 0x3f3   :  { %s4124_s14 = scalar_lea.hbm %s4311_s7, 256 }
 0x3f4   :  { %p4125_p9 = scmp.ne.s32.totalorder %s4311_s7, %s4124_s14  ;;  %p4128_p10 = scmp.lt.u32.totalorder %s4124_s14, %s4311_s7 }
 0x3f6   :  { %p4130_p11 = pnand %p4128_p10, %p4125_p9 }
 0x3f8   :  { %4133 = shalt.err (!%p4130_p11)
}
 0x3f9   :  { %s4154_s16 = smov 128   ;;  %s4155_s19 = smov 8  }
 0x3fa   :  { %3016 = dma.vmem_to_hbm [thread:$0]  %s3011_s9, 256, %s4311_s7, [#allocation4], %s4154_s16, %s4154_s16, %s4155_s19  }
 0x3fb   :  { %4140 = dma.done.wait [#allocation4], 256  }
 0x3fc   :  { %4141 = vsyncadd [#allocation4], 4294967040 }
 0x3fd   :  { %3020 = vsyncpa [#allocation3], 1 }
 0x3fe   :  { %3021 = vsyncpa [#allocation6], 1 }
 0x3ff   :  { %3022 = vsyncpa [#allocation9], 1 }
 0x400   :  { %3023 = vsyncpa [#allocation4], 1 }

</bundles_post_ra>
